<compile_context>
chip_gen: v6e
topology: v6e:2x2x1
jax: 0.10.0
libtpu: 0.0.40
codegen_flags: <defaults>
</compile_context>

<pallas_src>
import jax
import jax.numpy as jnp
from jax.experimental import pallas as pl
from jax.experimental.pallas import tpu as pltpu

INPUT_SIZE = 30
HIDDEN = 64          # logical hidden size (matches the PyTorch module); gates are 4*64=256 lanes
N_CLASS = 4


def _lstm_classifier_kernel(x_ref, wih0_ref, whh0_ref, b0_ref,
                            wih1_ref, whh1_ref, b1_ref,
                            wfc_ref, bfc_ref, out_ref):
    """All-in-VMEM stacked LSTM + classifier.

    x_ref    : (B*T, I) f32, batch-major rows (row = b*T + t)
    wih0_ref : (I, 4H) bf16   whh0_ref : (H, 4H) bf16   b0_ref : (1, 4H) f32
    wih1_ref : (H, 4H) bf16   whh1_ref : (H, 4H) bf16   b1_ref : (1, 4H) f32
    wfc_ref  : (H, C) bf16    bfc_ref  : (1, C) f32
    out_ref  : (B, C) f32

    i/f/o weight & bias columns are pre-scaled by 0.5 (single-tanh sigmoid recovery).
    Gate order: [i, f, g, o].
    """
    B = out_ref.shape[0]
    TB = x_ref.shape[0]
    T = TB // B
    H = HIDDEN
    G4 = whh0_ref.shape[1]            # 4 * H

    # ---- hoisted layer-0 input projection for ALL timesteps, kept in vregs ----
    g0 = (jnp.dot(x_ref[...].astype(jnp.bfloat16), wih0_ref[...],
                  preferred_element_type=jnp.float32)
          + b0_ref[...])                               # (B*T, 4H) f32
    g0 = g0.reshape(B, T, G4)                          # layout-friendly split (8 = sublane tile)

    b1b = jnp.broadcast_to(b1_ref[...], (B, G4))       # hoisted once (no per-iter broadcast)

    def cell(pre, c):
        # one EUP tanh pass over all 4 gates; sigmoid(z) = 0.5*tanh(z/2) + 0.5
        act = jnp.tanh(pre)
        i = act[:, 0 * H:1 * H] * 0.5 + 0.5
        f = act[:, 1 * H:2 * H] * 0.5 + 0.5
        g = act[:, 2 * H:3 * H]
        o = act[:, 3 * H:4 * H] * 0.5 + 0.5
        c_new = f * c + i * g
        h_new = o * jnp.tanh(c_new)
        return h_new, c_new

    h0 = c0 = h1 = c1 = jnp.zeros((B, H), jnp.float32)

    # T is a static Python int -> fully unrolled; g0 slices are static and only depend on
    # g0, so they are schedulable off the serial recurrence.
    for t in range(T):
        # layer 0: only the recurrent dot is on the serial critical path
        pre0 = g0[:, t, :] + jnp.dot(h0.astype(jnp.bfloat16), whh0_ref[...],
                                     preferred_element_type=jnp.float32)
        h0, c0 = cell(pre0, c0)
        # layer 1: split dots — rec1 depends only on the previous step's h1
        rec1 = jnp.dot(h1.astype(jnp.bfloat16), whh1_ref[...],
                       preferred_element_type=jnp.float32)
        in1 = jnp.dot(h0.astype(jnp.bfloat16), wih1_ref[...],
                      preferred_element_type=jnp.float32)
        h1, c1 = cell(in1 + rec1 + b1b, c1)

    # classifier on the last top-layer hidden state
    out_ref[...] = (jnp.dot(h1.astype(jnp.bfloat16), wfc_ref[...],
                            preferred_element_type=jnp.float32)
                    + bfc_ref[...])


@jax.jit
def lstm_classifier_forward(x, kernel_params):
    """x: (B, T, I) float32 (PyTorch batch_first). Returns (B, n_class) float32."""
    B, T, I = x.shape
    (wih0, whh0, b0, wih1, whh1, b1, wfc, bfc) = kernel_params
    G4 = 4 * HIDDEN

    # batch-major flatten only — free metadata reshape, no transpose / extra HBM pass
    x2 = x.reshape(B * T, I)

    flops = (2 * T * B * I * G4                     # hoisted input projection
             + T * 2 * B * HIDDEN * G4              # layer-0 recurrent dot
             + T * 2 * (2 * B * HIDDEN * G4)        # layer-1 two dots
             + 2 * B * HIDDEN * N_CLASS)            # classifier
    transcendentals = T * 2 * (B * G4 + B * HIDDEN)
    bytes_accessed = (x2.size * 4
                      + (wih0.size + whh0.size + wih1.size + whh1.size + wfc.size) * 2
                      + (b0.size + b1.size + bfc.size) * 4
                      + B * N_CLASS * 4)

    vmem = pl.BlockSpec(memory_space=pltpu.MemorySpace.VMEM)
    return pl.pallas_call(
        _lstm_classifier_kernel,
        out_shape=jax.ShapeDtypeStruct((B, N_CLASS), jnp.float32),
        in_specs=[vmem] * 9,
        out_specs=vmem,
        cost_estimate=pl.CostEstimate(flops=flops,
                                      transcendentals=transcendentals,
                                      bytes_accessed=bytes_accessed),
    )(x2, wih0, whh0, b0, wih1, whh1, b1, wfc, bfc)


def init_torch_params(key):
    """PyTorch-layout parameters with nn.LSTM-style init U(-1/sqrt(H), 1/sqrt(H))."""
    k = 1.0 / jnp.sqrt(jnp.float32(HIDDEN))
    keys = jax.random.split(key, 10)

    def u(kk, shape):
        return jax.random.uniform(kk, shape, jnp.float32, minval=-k, maxval=k)

    w_ih_l0 = u(keys[0], (4 * HIDDEN, INPUT_SIZE))
    w_hh_l0 = u(keys[1], (4 * HIDDEN, HIDDEN))
    b_ih_l0 = u(keys[2], (4 * HIDDEN,))
    b_hh_l0 = u(keys[3], (4 * HIDDEN,))
    w_ih_l1 = u(keys[4], (4 * HIDDEN, HIDDEN))
    w_hh_l1 = u(keys[5], (4 * HIDDEN, HIDDEN))
    b_ih_l1 = u(keys[6], (4 * HIDDEN,))
    b_hh_l1 = u(keys[7], (4 * HIDDEN,))
    w_fc = u(keys[8], (N_CLASS, HIDDEN))
    b_fc = u(keys[9], (N_CLASS,))
    return (w_ih_l0, w_hh_l0, b_ih_l0, b_hh_l0,
            w_ih_l1, w_hh_l1, b_ih_l1, b_hh_l1, w_fc, b_fc)


def pack_params(torch_params):
    """Pre-transpose, pre-scale i/f/o gate columns by 0.5 (single-tanh activation),
    fuse the two biases, and store all MXU weights as bf16 (f32 accumulation in-kernel)."""
    (w_ih_l0, w_hh_l0, b_ih_l0, b_hh_l0,
     w_ih_l1, w_hh_l1, b_ih_l1, b_hh_l1, w_fc, b_fc) = torch_params
    H = HIDDEN
    # gate order [i, f, g, o]; scale i/f/o by 0.5 (exact in bf16), g untouched
    scale = jnp.concatenate([jnp.full((H,), 0.5), jnp.full((H,), 0.5),
                             jnp.ones((H,)), jnp.full((H,), 0.5)]).astype(jnp.float32)

    def pack_w(w):                                   # (4H, K) torch -> (K, 4H) bf16
        return (w.T * scale[None, :]).astype(jnp.bfloat16)

    def pack_b(b_ih, b_hh):                          # -> (1, 4H) f32
        return ((b_ih + b_hh) * scale).reshape(1, 4 * H).astype(jnp.float32)

    wih0 = pack_w(w_ih_l0)                           # (I, 4H)
    whh0 = pack_w(w_hh_l0)                           # (H, 4H)
    b0 = pack_b(b_ih_l0, b_hh_l0)
    wih1 = pack_w(w_ih_l1)                           # (H, 4H)
    whh1 = pack_w(w_hh_l1)                           # (H, 4H)
    b1 = pack_b(b_ih_l1, b_hh_l1)
    wfc = w_fc.T.astype(jnp.bfloat16)                # (H, C)
    bfc = b_fc.reshape(1, N_CLASS).astype(jnp.float32)
    return (wih0, whh0, b0, wih1, whh1, b1, wfc, bfc)


def reference_forward(x, torch_params, matmul_dtype=jnp.float32):
    """Pure-JAX reference matching PyTorch nn.LSTM(2 layers, batch_first) + Linear.
    matmul_dtype=bf16 mirrors the kernel's MXU operand precision (f32 accumulation)."""
    (w_ih_l0, w_hh_l0, b_ih_l0, b_hh_l0,
     w_ih_l1, w_hh_l1, b_ih_l1, b_hh_l1, w_fc, b_fc) = torch_params
    B, T, _ = x.shape
    H = HIDDEN

    def mm(a, w):   # a @ w.T with operand cast + f32 accumulation
        return jnp.dot(a.astype(matmul_dtype), w.T.astype(matmul_dtype),
                       preferred_element_type=jnp.float32)

    def cell(x_t, h, c, w_ih, w_hh, b_ih, b_hh):
        g = mm(x_t, w_ih) + mm(h, w_hh) + b_ih + b_hh
        i = jax.nn.sigmoid(g[:, 0 * H:1 * H])
        f = jax.nn.sigmoid(g[:, 1 * H:2 * H])
        gg = jnp.tanh(g[:, 2 * H:3 * H])
        o = jax.nn.sigmoid(g[:, 3 * H:4 * H])
        c = f * c + i * gg
        h = o * jnp.tanh(c)
        return h, c

    h0 = c0 = h1 = c1 = jnp.zeros((B, H), jnp.float32)
    for t in range(T):
        h0, c0 = cell(x[:, t, :], h0, c0, w_ih_l0, w_hh_l0, b_ih_l0, b_hh_l0)
        h1, c1 = cell(h0, h1, c1, w_ih_l1, w_hh_l1, b_ih_l1, b_hh_l1)
    return mm(h1, w_fc) + b_fc


if __name__ == "__main__":
    key = jax.random.PRNGKey(0)
    k_x, k_p = jax.random.split(key)

    B, T = 2, 8
    x = jax.random.normal(k_x, (B, T, INPUT_SIZE), dtype=jnp.float32)
    torch_params = init_torch_params(k_p)
    kernel_params = pack_params(torch_params)

    out = jax.block_until_ready(lstm_classifier_forward(x, kernel_params))
    assert out.shape == (B, N_CLASS)

    # structural correctness: reference run with matching bf16 matmul precision (tight)
    ref_bf16 = reference_forward(x, torch_params, matmul_dtype=jnp.bfloat16)
    assert jnp.allclose(out, ref_bf16, rtol=5e-3, atol=5e-3), (out, ref_bf16)

    # mixed-precision drift vs full-f32 PyTorch semantics (loose, documents bf16 weights)
    ref_f32 = reference_forward(x, torch_params, matmul_dtype=jnp.float32)
    assert jnp.allclose(out, ref_f32, rtol=1e-1, atol=1e-1), (out, ref_f32)

    print("KERNEL_OK")
</pallas_src>

<mosaic_0001>
module attributes {stable_mosaic.version = 11 : i64} {
  func.func @_lstm_classifier_kernel(%arg0: memref<16x30xf32, #tpu.memory_space<vmem>>, %arg1: memref<30x256xbf16, #tpu.memory_space<vmem>>, %arg2: memref<64x256xbf16, #tpu.memory_space<vmem>>, %arg3: memref<1x256xf32, #tpu.memory_space<vmem>>, %arg4: memref<64x256xbf16, #tpu.memory_space<vmem>>, %arg5: memref<64x256xbf16, #tpu.memory_space<vmem>>, %arg6: memref<1x256xf32, #tpu.memory_space<vmem>>, %arg7: memref<64x4xbf16, #tpu.memory_space<vmem>>, %arg8: memref<1x4xf32, #tpu.memory_space<vmem>>, %arg9: memref<2x4xf32, #tpu.memory_space<vmem>>) attributes {dimension_semantics = [], scalar_prefetch = 0 : i64, scratch_operands = 0 : i64, tpu.core_type = #tpu.core_type<tc>} {
    %c0 = arith.constant 0 : index
    %c0_0 = arith.constant 0 : index
    %0 = vector.load %arg0[%c0, %c0_0] : memref<16x30xf32, #tpu.memory_space<vmem>>, vector<16x30xf32>
    %1 = arith.truncf %0 : vector<16x30xf32> to vector<16x30xbf16>
    %c0_1 = arith.constant 0 : index
    %c0_2 = arith.constant 0 : index
    %2 = vector.load %arg1[%c0_1, %c0_2] : memref<30x256xbf16, #tpu.memory_space<vmem>>, vector<30x256xbf16>
    %cst = arith.constant dense<0.000000e+00> : vector<16x256xf32>
    %3 = tpu.matmul %1, %2, %cst {dimension_numbers = #tpu.dot_dimension_numbers<[1], [0], [0], [1], [0, 0, 1, 1], [], []>} : vector<16x30xbf16>, vector<30x256xbf16>, vector<16x256xf32> -> vector<16x256xf32>
    %c0_3 = arith.constant 0 : index
    %c0_4 = arith.constant 0 : index
    %4 = vector.load %arg3[%c0_3, %c0_4] : memref<1x256xf32, #tpu.memory_space<vmem>>, vector<1x256xf32>
    %5 = vector.broadcast %4 : vector<1x256xf32> to vector<16x256xf32>
    %6 = arith.addf %3, %5 : vector<16x256xf32>
    %7 = vector.shape_cast %6 : vector<16x256xf32> to vector<2x8x256xf32>
    %c0_5 = arith.constant 0 : index
    %c0_6 = arith.constant 0 : index
    %8 = vector.load %arg6[%c0_5, %c0_6] : memref<1x256xf32, #tpu.memory_space<vmem>>, vector<1x256xf32>
    %9 = vector.shape_cast %8 : vector<1x256xf32> to vector<1x256xf32>
    %10 = vector.broadcast %9 : vector<1x256xf32> to vector<2x256xf32>
    %cst_7 = arith.constant 0.000000e+00 : f32
    %11 = vector.broadcast %cst_7 : f32 to vector<2x64xf32>
    %12 = vector.extract_strided_slice %7 {offsets = [0, 0, 0], sizes = [2, 1, 256], strides = [1, 1, 1]} : vector<2x8x256xf32> to vector<2x1x256xf32>
    %13 = vector.shape_cast %12 : vector<2x1x256xf32> to vector<2x256xf32>
    %14 = arith.truncf %11 : vector<2x64xf32> to vector<2x64xbf16>
    %c0_8 = arith.constant 0 : index
    %c0_9 = arith.constant 0 : index
    %15 = vector.load %arg2[%c0_8, %c0_9] : memref<64x256xbf16, #tpu.memory_space<vmem>>, vector<64x256xbf16>
    %cst_10 = arith.constant dense<0.000000e+00> : vector<2x256xf32>
    %16 = tpu.matmul %14, %15, %cst_10 {dimension_numbers = #tpu.dot_dimension_numbers<[1], [0], [0], [1], [0, 0, 1, 1], [], []>} : vector<2x64xbf16>, vector<64x256xbf16>, vector<2x256xf32> -> vector<2x256xf32>
    %17 = arith.addf %13, %16 : vector<2x256xf32>
    %18 = math.tanh %17 : vector<2x256xf32>
    %19 = vector.extract_strided_slice %18 {offsets = [0, 0], sizes = [2, 64], strides = [1, 1]} : vector<2x256xf32> to vector<2x64xf32>
    %cst_11 = arith.constant 5.000000e-01 : f32
    %20 = vector.broadcast %cst_11 : f32 to vector<2x64xf32>
    %21 = arith.mulf %19, %20 : vector<2x64xf32>
    %cst_12 = arith.constant 5.000000e-01 : f32
    %22 = vector.broadcast %cst_12 : f32 to vector<2x64xf32>
    %23 = arith.addf %21, %22 : vector<2x64xf32>
    %24 = vector.extract_strided_slice %18 {offsets = [0, 64], sizes = [2, 64], strides = [1, 1]} : vector<2x256xf32> to vector<2x64xf32>
    %cst_13 = arith.constant 5.000000e-01 : f32
    %25 = vector.broadcast %cst_13 : f32 to vector<2x64xf32>
    %26 = arith.mulf %24, %25 : vector<2x64xf32>
    %cst_14 = arith.constant 5.000000e-01 : f32
    %27 = vector.broadcast %cst_14 : f32 to vector<2x64xf32>
    %28 = arith.addf %26, %27 : vector<2x64xf32>
    %29 = vector.extract_strided_slice %18 {offsets = [0, 128], sizes = [2, 64], strides = [1, 1]} : vector<2x256xf32> to vector<2x64xf32>
    %30 = vector.extract_strided_slice %18 {offsets = [0, 192], sizes = [2, 64], strides = [1, 1]} : vector<2x256xf32> to vector<2x64xf32>
    %cst_15 = arith.constant 5.000000e-01 : f32
    %31 = vector.broadcast %cst_15 : f32 to vector<2x64xf32>
    %32 = arith.mulf %30, %31 : vector<2x64xf32>
    %cst_16 = arith.constant 5.000000e-01 : f32
    %33 = vector.broadcast %cst_16 : f32 to vector<2x64xf32>
    %34 = arith.addf %32, %33 : vector<2x64xf32>
    %35 = arith.mulf %28, %11 : vector<2x64xf32>
    %36 = arith.mulf %23, %29 : vector<2x64xf32>
    %37 = arith.addf %35, %36 : vector<2x64xf32>
    %38 = math.tanh %37 : vector<2x64xf32>
    %39 = arith.mulf %34, %38 : vector<2x64xf32>
    %40 = arith.truncf %11 : vector<2x64xf32> to vector<2x64xbf16>
    %c0_17 = arith.constant 0 : index
    %c0_18 = arith.constant 0 : index
    %41 = vector.load %arg5[%c0_17, %c0_18] : memref<64x256xbf16, #tpu.memory_space<vmem>>, vector<64x256xbf16>
    %cst_19 = arith.constant dense<0.000000e+00> : vector<2x256xf32>
    %42 = tpu.matmul %40, %41, %cst_19 {dimension_numbers = #tpu.dot_dimension_numbers<[1], [0], [0], [1], [0, 0, 1, 1], [], []>} : vector<2x64xbf16>, vector<64x256xbf16>, vector<2x256xf32> -> vector<2x256xf32>
    %43 = arith.truncf %39 : vector<2x64xf32> to vector<2x64xbf16>
    %c0_20 = arith.constant 0 : index
    %c0_21 = arith.constant 0 : index
    %44 = vector.load %arg4[%c0_20, %c0_21] : memref<64x256xbf16, #tpu.memory_space<vmem>>, vector<64x256xbf16>
    %cst_22 = arith.constant dense<0.000000e+00> : vector<2x256xf32>
    %45 = tpu.matmul %43, %44, %cst_22 {dimension_numbers = #tpu.dot_dimension_numbers<[1], [0], [0], [1], [0, 0, 1, 1], [], []>} : vector<2x64xbf16>, vector<64x256xbf16>, vector<2x256xf32> -> vector<2x256xf32>
    %46 = arith.addf %45, %42 : vector<2x256xf32>
    %47 = arith.addf %46, %10 : vector<2x256xf32>
    %48 = math.tanh %47 : vector<2x256xf32>
    %49 = vector.extract_strided_slice %48 {offsets = [0, 0], sizes = [2, 64], strides = [1, 1]} : vector<2x256xf32> to vector<2x64xf32>
    %cst_23 = arith.constant 5.000000e-01 : f32
    %50 = vector.broadcast %cst_23 : f32 to vector<2x64xf32>
    %51 = arith.mulf %49, %50 : vector<2x64xf32>
    %cst_24 = arith.constant 5.000000e-01 : f32
    %52 = vector.broadcast %cst_24 : f32 to vector<2x64xf32>
    %53 = arith.addf %51, %52 : vector<2x64xf32>
    %54 = vector.extract_strided_slice %48 {offsets = [0, 64], sizes = [2, 64], strides = [1, 1]} : vector<2x256xf32> to vector<2x64xf32>
    %cst_25 = arith.constant 5.000000e-01 : f32
    %55 = vector.broadcast %cst_25 : f32 to vector<2x64xf32>
    %56 = arith.mulf %54, %55 : vector<2x64xf32>
    %cst_26 = arith.constant 5.000000e-01 : f32
    %57 = vector.broadcast %cst_26 : f32 to vector<2x64xf32>
    %58 = arith.addf %56, %57 : vector<2x64xf32>
    %59 = vector.extract_strided_slice %48 {offsets = [0, 128], sizes = [2, 64], strides = [1, 1]} : vector<2x256xf32> to vector<2x64xf32>
    %60 = vector.extract_strided_slice %48 {offsets = [0, 192], sizes = [2, 64], strides = [1, 1]} : vector<2x256xf32> to vector<2x64xf32>
    %cst_27 = arith.constant 5.000000e-01 : f32
    %61 = vector.broadcast %cst_27 : f32 to vector<2x64xf32>
    %62 = arith.mulf %60, %61 : vector<2x64xf32>
    %cst_28 = arith.constant 5.000000e-01 : f32
    %63 = vector.broadcast %cst_28 : f32 to vector<2x64xf32>
    %64 = arith.addf %62, %63 : vector<2x64xf32>
    %65 = arith.mulf %58, %11 : vector<2x64xf32>
    %66 = arith.mulf %53, %59 : vector<2x64xf32>
    %67 = arith.addf %65, %66 : vector<2x64xf32>
    %68 = math.tanh %67 : vector<2x64xf32>
    %69 = arith.mulf %64, %68 : vector<2x64xf32>
    %70 = vector.extract_strided_slice %7 {offsets = [0, 1, 0], sizes = [2, 1, 256], strides = [1, 1, 1]} : vector<2x8x256xf32> to vector<2x1x256xf32>
    %71 = vector.shape_cast %70 : vector<2x1x256xf32> to vector<2x256xf32>
    %72 = arith.truncf %39 : vector<2x64xf32> to vector<2x64xbf16>
    %c0_29 = arith.constant 0 : index
    %c0_30 = arith.constant 0 : index
    %73 = vector.load %arg2[%c0_29, %c0_30] : memref<64x256xbf16, #tpu.memory_space<vmem>>, vector<64x256xbf16>
    %cst_31 = arith.constant dense<0.000000e+00> : vector<2x256xf32>
    %74 = tpu.matmul %72, %73, %cst_31 {dimension_numbers = #tpu.dot_dimension_numbers<[1], [0], [0], [1], [0, 0, 1, 1], [], []>} : vector<2x64xbf16>, vector<64x256xbf16>, vector<2x256xf32> -> vector<2x256xf32>
    %75 = arith.addf %71, %74 : vector<2x256xf32>
    %76 = math.tanh %75 : vector<2x256xf32>
    %77 = vector.extract_strided_slice %76 {offsets = [0, 0], sizes = [2, 64], strides = [1, 1]} : vector<2x256xf32> to vector<2x64xf32>
    %cst_32 = arith.constant 5.000000e-01 : f32
    %78 = vector.broadcast %cst_32 : f32 to vector<2x64xf32>
    %79 = arith.mulf %77, %78 : vector<2x64xf32>
    %cst_33 = arith.constant 5.000000e-01 : f32
    %80 = vector.broadcast %cst_33 : f32 to vector<2x64xf32>
    %81 = arith.addf %79, %80 : vector<2x64xf32>
    %82 = vector.extract_strided_slice %76 {offsets = [0, 64], sizes = [2, 64], strides = [1, 1]} : vector<2x256xf32> to vector<2x64xf32>
    %cst_34 = arith.constant 5.000000e-01 : f32
    %83 = vector.broadcast %cst_34 : f32 to vector<2x64xf32>
    %84 = arith.mulf %82, %83 : vector<2x64xf32>
    %cst_35 = arith.constant 5.000000e-01 : f32
    %85 = vector.broadcast %cst_35 : f32 to vector<2x64xf32>
    %86 = arith.addf %84, %85 : vector<2x64xf32>
    %87 = vector.extract_strided_slice %76 {offsets = [0, 128], sizes = [2, 64], strides = [1, 1]} : vector<2x256xf32> to vector<2x64xf32>
    %88 = vector.extract_strided_slice %76 {offsets = [0, 192], sizes = [2, 64], strides = [1, 1]} : vector<2x256xf32> to vector<2x64xf32>
    %cst_36 = arith.constant 5.000000e-01 : f32
    %89 = vector.broadcast %cst_36 : f32 to vector<2x64xf32>
    %90 = arith.mulf %88, %89 : vector<2x64xf32>
    %cst_37 = arith.constant 5.000000e-01 : f32
    %91 = vector.broadcast %cst_37 : f32 to vector<2x64xf32>
    %92 = arith.addf %90, %91 : vector<2x64xf32>
    %93 = arith.mulf %86, %37 : vector<2x64xf32>
    %94 = arith.mulf %81, %87 : vector<2x64xf32>
    %95 = arith.addf %93, %94 : vector<2x64xf32>
    %96 = math.tanh %95 : vector<2x64xf32>
    %97 = arith.mulf %92, %96 : vector<2x64xf32>
    %98 = arith.truncf %69 : vector<2x64xf32> to vector<2x64xbf16>
    %c0_38 = arith.constant 0 : index
    %c0_39 = arith.constant 0 : index
    %99 = vector.load %arg5[%c0_38, %c0_39] : memref<64x256xbf16, #tpu.memory_space<vmem>>, vector<64x256xbf16>
    %cst_40 = arith.constant dense<0.000000e+00> : vector<2x256xf32>
    %100 = tpu.matmul %98, %99, %cst_40 {dimension_numbers = #tpu.dot_dimension_numbers<[1], [0], [0], [1], [0, 0, 1, 1], [], []>} : vector<2x64xbf16>, vector<64x256xbf16>, vector<2x256xf32> -> vector<2x256xf32>
    %101 = arith.truncf %97 : vector<2x64xf32> to vector<2x64xbf16>
    %c0_41 = arith.constant 0 : index
    %c0_42 = arith.constant 0 : index
    %102 = vector.load %arg4[%c0_41, %c0_42] : memref<64x256xbf16, #tpu.memory_space<vmem>>, vector<64x256xbf16>
    %cst_43 = arith.constant dense<0.000000e+00> : vector<2x256xf32>
    %103 = tpu.matmul %101, %102, %cst_43 {dimension_numbers = #tpu.dot_dimension_numbers<[1], [0], [0], [1], [0, 0, 1, 1], [], []>} : vector<2x64xbf16>, vector<64x256xbf16>, vector<2x256xf32> -> vector<2x256xf32>
    %104 = arith.addf %103, %100 : vector<2x256xf32>
    %105 = arith.addf %104, %10 : vector<2x256xf32>
    %106 = math.tanh %105 : vector<2x256xf32>
    %107 = vector.extract_strided_slice %106 {offsets = [0, 0], sizes = [2, 64], strides = [1, 1]} : vector<2x256xf32> to vector<2x64xf32>
    %cst_44 = arith.constant 5.000000e-01 : f32
    %108 = vector.broadcast %cst_44 : f32 to vector<2x64xf32>
    %109 = arith.mulf %107, %108 : vector<2x64xf32>
    %cst_45 = arith.constant 5.000000e-01 : f32
    %110 = vector.broadcast %cst_45 : f32 to vector<2x64xf32>
    %111 = arith.addf %109, %110 : vector<2x64xf32>
    %112 = vector.extract_strided_slice %106 {offsets = [0, 64], sizes = [2, 64], strides = [1, 1]} : vector<2x256xf32> to vector<2x64xf32>
    %cst_46 = arith.constant 5.000000e-01 : f32
    %113 = vector.broadcast %cst_46 : f32 to vector<2x64xf32>
    %114 = arith.mulf %112, %113 : vector<2x64xf32>
    %cst_47 = arith.constant 5.000000e-01 : f32
    %115 = vector.broadcast %cst_47 : f32 to vector<2x64xf32>
    %116 = arith.addf %114, %115 : vector<2x64xf32>
    %117 = vector.extract_strided_slice %106 {offsets = [0, 128], sizes = [2, 64], strides = [1, 1]} : vector<2x256xf32> to vector<2x64xf32>
    %118 = vector.extract_strided_slice %106 {offsets = [0, 192], sizes = [2, 64], strides = [1, 1]} : vector<2x256xf32> to vector<2x64xf32>
    %cst_48 = arith.constant 5.000000e-01 : f32
    %119 = vector.broadcast %cst_48 : f32 to vector<2x64xf32>
    %120 = arith.mulf %118, %119 : vector<2x64xf32>
    %cst_49 = arith.constant 5.000000e-01 : f32
    %121 = vector.broadcast %cst_49 : f32 to vector<2x64xf32>
    %122 = arith.addf %120, %121 : vector<2x64xf32>
    %123 = arith.mulf %116, %67 : vector<2x64xf32>
    %124 = arith.mulf %111, %117 : vector<2x64xf32>
    %125 = arith.addf %123, %124 : vector<2x64xf32>
    %126 = math.tanh %125 : vector<2x64xf32>
    %127 = arith.mulf %122, %126 : vector<2x64xf32>
    %128 = vector.extract_strided_slice %7 {offsets = [0, 2, 0], sizes = [2, 1, 256], strides = [1, 1, 1]} : vector<2x8x256xf32> to vector<2x1x256xf32>
    %129 = vector.shape_cast %128 : vector<2x1x256xf32> to vector<2x256xf32>
    %130 = arith.truncf %97 : vector<2x64xf32> to vector<2x64xbf16>
    %c0_50 = arith.constant 0 : index
    %c0_51 = arith.constant 0 : index
    %131 = vector.load %arg2[%c0_50, %c0_51] : memref<64x256xbf16, #tpu.memory_space<vmem>>, vector<64x256xbf16>
    %cst_52 = arith.constant dense<0.000000e+00> : vector<2x256xf32>
    %132 = tpu.matmul %130, %131, %cst_52 {dimension_numbers = #tpu.dot_dimension_numbers<[1], [0], [0], [1], [0, 0, 1, 1], [], []>} : vector<2x64xbf16>, vector<64x256xbf16>, vector<2x256xf32> -> vector<2x256xf32>
    %133 = arith.addf %129, %132 : vector<2x256xf32>
    %134 = math.tanh %133 : vector<2x256xf32>
    %135 = vector.extract_strided_slice %134 {offsets = [0, 0], sizes = [2, 64], strides = [1, 1]} : vector<2x256xf32> to vector<2x64xf32>
    %cst_53 = arith.constant 5.000000e-01 : f32
    %136 = vector.broadcast %cst_53 : f32 to vector<2x64xf32>
    %137 = arith.mulf %135, %136 : vector<2x64xf32>
    %cst_54 = arith.constant 5.000000e-01 : f32
    %138 = vector.broadcast %cst_54 : f32 to vector<2x64xf32>
    %139 = arith.addf %137, %138 : vector<2x64xf32>
    %140 = vector.extract_strided_slice %134 {offsets = [0, 64], sizes = [2, 64], strides = [1, 1]} : vector<2x256xf32> to vector<2x64xf32>
    %cst_55 = arith.constant 5.000000e-01 : f32
    %141 = vector.broadcast %cst_55 : f32 to vector<2x64xf32>
    %142 = arith.mulf %140, %141 : vector<2x64xf32>
    %cst_56 = arith.constant 5.000000e-01 : f32
    %143 = vector.broadcast %cst_56 : f32 to vector<2x64xf32>
    %144 = arith.addf %142, %143 : vector<2x64xf32>
    %145 = vector.extract_strided_slice %134 {offsets = [0, 128], sizes = [2, 64], strides = [1, 1]} : vector<2x256xf32> to vector<2x64xf32>
    %146 = vector.extract_strided_slice %134 {offsets = [0, 192], sizes = [2, 64], strides = [1, 1]} : vector<2x256xf32> to vector<2x64xf32>
    %cst_57 = arith.constant 5.000000e-01 : f32
    %147 = vector.broadcast %cst_57 : f32 to vector<2x64xf32>
    %148 = arith.mulf %146, %147 : vector<2x64xf32>
    %cst_58 = arith.constant 5.000000e-01 : f32
    %149 = vector.broadcast %cst_58 : f32 to vector<2x64xf32>
    %150 = arith.addf %148, %149 : vector<2x64xf32>
    %151 = arith.mulf %144, %95 : vector<2x64xf32>
    %152 = arith.mulf %139, %145 : vector<2x64xf32>
    %153 = arith.addf %151, %152 : vector<2x64xf32>
    %154 = math.tanh %153 : vector<2x64xf32>
    %155 = arith.mulf %150, %154 : vector<2x64xf32>
    %156 = arith.truncf %127 : vector<2x64xf32> to vector<2x64xbf16>
    %c0_59 = arith.constant 0 : index
    %c0_60 = arith.constant 0 : index
    %157 = vector.load %arg5[%c0_59, %c0_60] : memref<64x256xbf16, #tpu.memory_space<vmem>>, vector<64x256xbf16>
    %cst_61 = arith.constant dense<0.000000e+00> : vector<2x256xf32>
    %158 = tpu.matmul %156, %157, %cst_61 {dimension_numbers = #tpu.dot_dimension_numbers<[1], [0], [0], [1], [0, 0, 1, 1], [], []>} : vector<2x64xbf16>, vector<64x256xbf16>, vector<2x256xf32> -> vector<2x256xf32>
    %159 = arith.truncf %155 : vector<2x64xf32> to vector<2x64xbf16>
    %c0_62 = arith.constant 0 : index
    %c0_63 = arith.constant 0 : index
    %160 = vector.load %arg4[%c0_62, %c0_63] : memref<64x256xbf16, #tpu.memory_space<vmem>>, vector<64x256xbf16>
    %cst_64 = arith.constant dense<0.000000e+00> : vector<2x256xf32>
    %161 = tpu.matmul %159, %160, %cst_64 {dimension_numbers = #tpu.dot_dimension_numbers<[1], [0], [0], [1], [0, 0, 1, 1], [], []>} : vector<2x64xbf16>, vector<64x256xbf16>, vector<2x256xf32> -> vector<2x256xf32>
    %162 = arith.addf %161, %158 : vector<2x256xf32>
    %163 = arith.addf %162, %10 : vector<2x256xf32>
    %164 = math.tanh %163 : vector<2x256xf32>
    %165 = vector.extract_strided_slice %164 {offsets = [0, 0], sizes = [2, 64], strides = [1, 1]} : vector<2x256xf32> to vector<2x64xf32>
    %cst_65 = arith.constant 5.000000e-01 : f32
    %166 = vector.broadcast %cst_65 : f32 to vector<2x64xf32>
    %167 = arith.mulf %165, %166 : vector<2x64xf32>
    %cst_66 = arith.constant 5.000000e-01 : f32
    %168 = vector.broadcast %cst_66 : f32 to vector<2x64xf32>
    %169 = arith.addf %167, %168 : vector<2x64xf32>
    %170 = vector.extract_strided_slice %164 {offsets = [0, 64], sizes = [2, 64], strides = [1, 1]} : vector<2x256xf32> to vector<2x64xf32>
    %cst_67 = arith.constant 5.000000e-01 : f32
    %171 = vector.broadcast %cst_67 : f32 to vector<2x64xf32>
    %172 = arith.mulf %170, %171 : vector<2x64xf32>
    %cst_68 = arith.constant 5.000000e-01 : f32
    %173 = vector.broadcast %cst_68 : f32 to vector<2x64xf32>
    %174 = arith.addf %172, %173 : vector<2x64xf32>
    %175 = vector.extract_strided_slice %164 {offsets = [0, 128], sizes = [2, 64], strides = [1, 1]} : vector<2x256xf32> to vector<2x64xf32>
    %176 = vector.extract_strided_slice %164 {offsets = [0, 192], sizes = [2, 64], strides = [1, 1]} : vector<2x256xf32> to vector<2x64xf32>
    %cst_69 = arith.constant 5.000000e-01 : f32
    %177 = vector.broadcast %cst_69 : f32 to vector<2x64xf32>
    %178 = arith.mulf %176, %177 : vector<2x64xf32>
    %cst_70 = arith.constant 5.000000e-01 : f32
    %179 = vector.broadcast %cst_70 : f32 to vector<2x64xf32>
    %180 = arith.addf %178, %179 : vector<2x64xf32>
    %181 = arith.mulf %174, %125 : vector<2x64xf32>
    %182 = arith.mulf %169, %175 : vector<2x64xf32>
    %183 = arith.addf %181, %182 : vector<2x64xf32>
    %184 = math.tanh %183 : vector<2x64xf32>
    %185 = arith.mulf %180, %184 : vector<2x64xf32>
    %186 = vector.extract_strided_slice %7 {offsets = [0, 3, 0], sizes = [2, 1, 256], strides = [1, 1, 1]} : vector<2x8x256xf32> to vector<2x1x256xf32>
    %187 = vector.shape_cast %186 : vector<2x1x256xf32> to vector<2x256xf32>
    %188 = arith.truncf %155 : vector<2x64xf32> to vector<2x64xbf16>
    %c0_71 = arith.constant 0 : index
    %c0_72 = arith.constant 0 : index
    %189 = vector.load %arg2[%c0_71, %c0_72] : memref<64x256xbf16, #tpu.memory_space<vmem>>, vector<64x256xbf16>
    %cst_73 = arith.constant dense<0.000000e+00> : vector<2x256xf32>
    %190 = tpu.matmul %188, %189, %cst_73 {dimension_numbers = #tpu.dot_dimension_numbers<[1], [0], [0], [1], [0, 0, 1, 1], [], []>} : vector<2x64xbf16>, vector<64x256xbf16>, vector<2x256xf32> -> vector<2x256xf32>
    %191 = arith.addf %187, %190 : vector<2x256xf32>
    %192 = math.tanh %191 : vector<2x256xf32>
    %193 = vector.extract_strided_slice %192 {offsets = [0, 0], sizes = [2, 64], strides = [1, 1]} : vector<2x256xf32> to vector<2x64xf32>
    %cst_74 = arith.constant 5.000000e-01 : f32
    %194 = vector.broadcast %cst_74 : f32 to vector<2x64xf32>
    %195 = arith.mulf %193, %194 : vector<2x64xf32>
    %cst_75 = arith.constant 5.000000e-01 : f32
    %196 = vector.broadcast %cst_75 : f32 to vector<2x64xf32>
    %197 = arith.addf %195, %196 : vector<2x64xf32>
    %198 = vector.extract_strided_slice %192 {offsets = [0, 64], sizes = [2, 64], strides = [1, 1]} : vector<2x256xf32> to vector<2x64xf32>
    %cst_76 = arith.constant 5.000000e-01 : f32
    %199 = vector.broadcast %cst_76 : f32 to vector<2x64xf32>
    %200 = arith.mulf %198, %199 : vector<2x64xf32>
    %cst_77 = arith.constant 5.000000e-01 : f32
    %201 = vector.broadcast %cst_77 : f32 to vector<2x64xf32>
    %202 = arith.addf %200, %201 : vector<2x64xf32>
    %203 = vector.extract_strided_slice %192 {offsets = [0, 128], sizes = [2, 64], strides = [1, 1]} : vector<2x256xf32> to vector<2x64xf32>
    %204 = vector.extract_strided_slice %192 {offsets = [0, 192], sizes = [2, 64], strides = [1, 1]} : vector<2x256xf32> to vector<2x64xf32>
    %cst_78 = arith.constant 5.000000e-01 : f32
    %205 = vector.broadcast %cst_78 : f32 to vector<2x64xf32>
    %206 = arith.mulf %204, %205 : vector<2x64xf32>
    %cst_79 = arith.constant 5.000000e-01 : f32
    %207 = vector.broadcast %cst_79 : f32 to vector<2x64xf32>
    %208 = arith.addf %206, %207 : vector<2x64xf32>
    %209 = arith.mulf %202, %153 : vector<2x64xf32>
    %210 = arith.mulf %197, %203 : vector<2x64xf32>
    %211 = arith.addf %209, %210 : vector<2x64xf32>
    %212 = math.tanh %211 : vector<2x64xf32>
    %213 = arith.mulf %208, %212 : vector<2x64xf32>
    %214 = arith.truncf %185 : vector<2x64xf32> to vector<2x64xbf16>
    %c0_80 = arith.constant 0 : index
    %c0_81 = arith.constant 0 : index
    %215 = vector.load %arg5[%c0_80, %c0_81] : memref<64x256xbf16, #tpu.memory_space<vmem>>, vector<64x256xbf16>
    %cst_82 = arith.constant dense<0.000000e+00> : vector<2x256xf32>
    %216 = tpu.matmul %214, %215, %cst_82 {dimension_numbers = #tpu.dot_dimension_numbers<[1], [0], [0], [1], [0, 0, 1, 1], [], []>} : vector<2x64xbf16>, vector<64x256xbf16>, vector<2x256xf32> -> vector<2x256xf32>
    %217 = arith.truncf %213 : vector<2x64xf32> to vector<2x64xbf16>
    %c0_83 = arith.constant 0 : index
    %c0_84 = arith.constant 0 : index
    %218 = vector.load %arg4[%c0_83, %c0_84] : memref<64x256xbf16, #tpu.memory_space<vmem>>, vector<64x256xbf16>
    %cst_85 = arith.constant dense<0.000000e+00> : vector<2x256xf32>
    %219 = tpu.matmul %217, %218, %cst_85 {dimension_numbers = #tpu.dot_dimension_numbers<[1], [0], [0], [1], [0, 0, 1, 1], [], []>} : vector<2x64xbf16>, vector<64x256xbf16>, vector<2x256xf32> -> vector<2x256xf32>
    %220 = arith.addf %219, %216 : vector<2x256xf32>
    %221 = arith.addf %220, %10 : vector<2x256xf32>
    %222 = math.tanh %221 : vector<2x256xf32>
    %223 = vector.extract_strided_slice %222 {offsets = [0, 0], sizes = [2, 64], strides = [1, 1]} : vector<2x256xf32> to vector<2x64xf32>
    %cst_86 = arith.constant 5.000000e-01 : f32
    %224 = vector.broadcast %cst_86 : f32 to vector<2x64xf32>
    %225 = arith.mulf %223, %224 : vector<2x64xf32>
    %cst_87 = arith.constant 5.000000e-01 : f32
    %226 = vector.broadcast %cst_87 : f32 to vector<2x64xf32>
    %227 = arith.addf %225, %226 : vector<2x64xf32>
    %228 = vector.extract_strided_slice %222 {offsets = [0, 64], sizes = [2, 64], strides = [1, 1]} : vector<2x256xf32> to vector<2x64xf32>
    %cst_88 = arith.constant 5.000000e-01 : f32
    %229 = vector.broadcast %cst_88 : f32 to vector<2x64xf32>
    %230 = arith.mulf %228, %229 : vector<2x64xf32>
    %cst_89 = arith.constant 5.000000e-01 : f32
    %231 = vector.broadcast %cst_89 : f32 to vector<2x64xf32>
    %232 = arith.addf %230, %231 : vector<2x64xf32>
    %233 = vector.extract_strided_slice %222 {offsets = [0, 128], sizes = [2, 64], strides = [1, 1]} : vector<2x256xf32> to vector<2x64xf32>
    %234 = vector.extract_strided_slice %222 {offsets = [0, 192], sizes = [2, 64], strides = [1, 1]} : vector<2x256xf32> to vector<2x64xf32>
    %cst_90 = arith.constant 5.000000e-01 : f32
    %235 = vector.broadcast %cst_90 : f32 to vector<2x64xf32>
    %236 = arith.mulf %234, %235 : vector<2x64xf32>
    %cst_91 = arith.constant 5.000000e-01 : f32
    %237 = vector.broadcast %cst_91 : f32 to vector<2x64xf32>
    %238 = arith.addf %236, %237 : vector<2x64xf32>
    %239 = arith.mulf %232, %183 : vector<2x64xf32>
    %240 = arith.mulf %227, %233 : vector<2x64xf32>
    %241 = arith.addf %239, %240 : vector<2x64xf32>
    %242 = math.tanh %241 : vector<2x64xf32>
    %243 = arith.mulf %238, %242 : vector<2x64xf32>
    %244 = vector.extract_strided_slice %7 {offsets = [0, 4, 0], sizes = [2, 1, 256], strides = [1, 1, 1]} : vector<2x8x256xf32> to vector<2x1x256xf32>
    %245 = vector.shape_cast %244 : vector<2x1x256xf32> to vector<2x256xf32>
    %246 = arith.truncf %213 : vector<2x64xf32> to vector<2x64xbf16>
    %c0_92 = arith.constant 0 : index
    %c0_93 = arith.constant 0 : index
    %247 = vector.load %arg2[%c0_92, %c0_93] : memref<64x256xbf16, #tpu.memory_space<vmem>>, vector<64x256xbf16>
    %cst_94 = arith.constant dense<0.000000e+00> : vector<2x256xf32>
    %248 = tpu.matmul %246, %247, %cst_94 {dimension_numbers = #tpu.dot_dimension_numbers<[1], [0], [0], [1], [0, 0, 1, 1], [], []>} : vector<2x64xbf16>, vector<64x256xbf16>, vector<2x256xf32> -> vector<2x256xf32>
    %249 = arith.addf %245, %248 : vector<2x256xf32>
    %250 = math.tanh %249 : vector<2x256xf32>
    %251 = vector.extract_strided_slice %250 {offsets = [0, 0], sizes = [2, 64], strides = [1, 1]} : vector<2x256xf32> to vector<2x64xf32>
    %cst_95 = arith.constant 5.000000e-01 : f32
    %252 = vector.broadcast %cst_95 : f32 to vector<2x64xf32>
    %253 = arith.mulf %251, %252 : vector<2x64xf32>
    %cst_96 = arith.constant 5.000000e-01 : f32
    %254 = vector.broadcast %cst_96 : f32 to vector<2x64xf32>
    %255 = arith.addf %253, %254 : vector<2x64xf32>
    %256 = vector.extract_strided_slice %250 {offsets = [0, 64], sizes = [2, 64], strides = [1, 1]} : vector<2x256xf32> to vector<2x64xf32>
    %cst_97 = arith.constant 5.000000e-01 : f32
    %257 = vector.broadcast %cst_97 : f32 to vector<2x64xf32>
    %258 = arith.mulf %256, %257 : vector<2x64xf32>
    %cst_98 = arith.constant 5.000000e-01 : f32
    %259 = vector.broadcast %cst_98 : f32 to vector<2x64xf32>
    %260 = arith.addf %258, %259 : vector<2x64xf32>
    %261 = vector.extract_strided_slice %250 {offsets = [0, 128], sizes = [2, 64], strides = [1, 1]} : vector<2x256xf32> to vector<2x64xf32>
    %262 = vector.extract_strided_slice %250 {offsets = [0, 192], sizes = [2, 64], strides = [1, 1]} : vector<2x256xf32> to vector<2x64xf32>
    %cst_99 = arith.constant 5.000000e-01 : f32
    %263 = vector.broadcast %cst_99 : f32 to vector<2x64xf32>
    %264 = arith.mulf %262, %263 : vector<2x64xf32>
    %cst_100 = arith.constant 5.000000e-01 : f32
    %265 = vector.broadcast %cst_100 : f32 to vector<2x64xf32>
    %266 = arith.addf %264, %265 : vector<2x64xf32>
    %267 = arith.mulf %260, %211 : vector<2x64xf32>
    %268 = arith.mulf %255, %261 : vector<2x64xf32>
    %269 = arith.addf %267, %268 : vector<2x64xf32>
    %270 = math.tanh %269 : vector<2x64xf32>
    %271 = arith.mulf %266, %270 : vector<2x64xf32>
    %272 = arith.truncf %243 : vector<2x64xf32> to vector<2x64xbf16>
    %c0_101 = arith.constant 0 : index
    %c0_102 = arith.constant 0 : index
    %273 = vector.load %arg5[%c0_101, %c0_102] : memref<64x256xbf16, #tpu.memory_space<vmem>>, vector<64x256xbf16>
    %cst_103 = arith.constant dense<0.000000e+00> : vector<2x256xf32>
    %274 = tpu.matmul %272, %273, %cst_103 {dimension_numbers = #tpu.dot_dimension_numbers<[1], [0], [0], [1], [0, 0, 1, 1], [], []>} : vector<2x64xbf16>, vector<64x256xbf16>, vector<2x256xf32> -> vector<2x256xf32>
    %275 = arith.truncf %271 : vector<2x64xf32> to vector<2x64xbf16>
    %c0_104 = arith.constant 0 : index
    %c0_105 = arith.constant 0 : index
    %276 = vector.load %arg4[%c0_104, %c0_105] : memref<64x256xbf16, #tpu.memory_space<vmem>>, vector<64x256xbf16>
    %cst_106 = arith.constant dense<0.000000e+00> : vector<2x256xf32>
    %277 = tpu.matmul %275, %276, %cst_106 {dimension_numbers = #tpu.dot_dimension_numbers<[1], [0], [0], [1], [0, 0, 1, 1], [], []>} : vector<2x64xbf16>, vector<64x256xbf16>, vector<2x256xf32> -> vector<2x256xf32>
    %278 = arith.addf %277, %274 : vector<2x256xf32>
    %279 = arith.addf %278, %10 : vector<2x256xf32>
    %280 = math.tanh %279 : vector<2x256xf32>
    %281 = vector.extract_strided_slice %280 {offsets = [0, 0], sizes = [2, 64], strides = [1, 1]} : vector<2x256xf32> to vector<2x64xf32>
    %cst_107 = arith.constant 5.000000e-01 : f32
    %282 = vector.broadcast %cst_107 : f32 to vector<2x64xf32>
    %283 = arith.mulf %281, %282 : vector<2x64xf32>
    %cst_108 = arith.constant 5.000000e-01 : f32
    %284 = vector.broadcast %cst_108 : f32 to vector<2x64xf32>
    %285 = arith.addf %283, %284 : vector<2x64xf32>
    %286 = vector.extract_strided_slice %280 {offsets = [0, 64], sizes = [2, 64], strides = [1, 1]} : vector<2x256xf32> to vector<2x64xf32>
    %cst_109 = arith.constant 5.000000e-01 : f32
    %287 = vector.broadcast %cst_109 : f32 to vector<2x64xf32>
    %288 = arith.mulf %286, %287 : vector<2x64xf32>
    %cst_110 = arith.constant 5.000000e-01 : f32
    %289 = vector.broadcast %cst_110 : f32 to vector<2x64xf32>
    %290 = arith.addf %288, %289 : vector<2x64xf32>
    %291 = vector.extract_strided_slice %280 {offsets = [0, 128], sizes = [2, 64], strides = [1, 1]} : vector<2x256xf32> to vector<2x64xf32>
    %292 = vector.extract_strided_slice %280 {offsets = [0, 192], sizes = [2, 64], strides = [1, 1]} : vector<2x256xf32> to vector<2x64xf32>
    %cst_111 = arith.constant 5.000000e-01 : f32
    %293 = vector.broadcast %cst_111 : f32 to vector<2x64xf32>
    %294 = arith.mulf %292, %293 : vector<2x64xf32>
    %cst_112 = arith.constant 5.000000e-01 : f32
    %295 = vector.broadcast %cst_112 : f32 to vector<2x64xf32>
    %296 = arith.addf %294, %295 : vector<2x64xf32>
    %297 = arith.mulf %290, %241 : vector<2x64xf32>
    %298 = arith.mulf %285, %291 : vector<2x64xf32>
    %299 = arith.addf %297, %298 : vector<2x64xf32>
    %300 = math.tanh %299 : vector<2x64xf32>
    %301 = arith.mulf %296, %300 : vector<2x64xf32>
    %302 = vector.extract_strided_slice %7 {offsets = [0, 5, 0], sizes = [2, 1, 256], strides = [1, 1, 1]} : vector<2x8x256xf32> to vector<2x1x256xf32>
    %303 = vector.shape_cast %302 : vector<2x1x256xf32> to vector<2x256xf32>
    %304 = arith.truncf %271 : vector<2x64xf32> to vector<2x64xbf16>
    %c0_113 = arith.constant 0 : index
    %c0_114 = arith.constant 0 : index
    %305 = vector.load %arg2[%c0_113, %c0_114] : memref<64x256xbf16, #tpu.memory_space<vmem>>, vector<64x256xbf16>
    %cst_115 = arith.constant dense<0.000000e+00> : vector<2x256xf32>
    %306 = tpu.matmul %304, %305, %cst_115 {dimension_numbers = #tpu.dot_dimension_numbers<[1], [0], [0], [1], [0, 0, 1, 1], [], []>} : vector<2x64xbf16>, vector<64x256xbf16>, vector<2x256xf32> -> vector<2x256xf32>
    %307 = arith.addf %303, %306 : vector<2x256xf32>
    %308 = math.tanh %307 : vector<2x256xf32>
    %309 = vector.extract_strided_slice %308 {offsets = [0, 0], sizes = [2, 64], strides = [1, 1]} : vector<2x256xf32> to vector<2x64xf32>
    %cst_116 = arith.constant 5.000000e-01 : f32
    %310 = vector.broadcast %cst_116 : f32 to vector<2x64xf32>
    %311 = arith.mulf %309, %310 : vector<2x64xf32>
    %cst_117 = arith.constant 5.000000e-01 : f32
    %312 = vector.broadcast %cst_117 : f32 to vector<2x64xf32>
    %313 = arith.addf %311, %312 : vector<2x64xf32>
    %314 = vector.extract_strided_slice %308 {offsets = [0, 64], sizes = [2, 64], strides = [1, 1]} : vector<2x256xf32> to vector<2x64xf32>
    %cst_118 = arith.constant 5.000000e-01 : f32
    %315 = vector.broadcast %cst_118 : f32 to vector<2x64xf32>
    %316 = arith.mulf %314, %315 : vector<2x64xf32>
    %cst_119 = arith.constant 5.000000e-01 : f32
    %317 = vector.broadcast %cst_119 : f32 to vector<2x64xf32>
    %318 = arith.addf %316, %317 : vector<2x64xf32>
    %319 = vector.extract_strided_slice %308 {offsets = [0, 128], sizes = [2, 64], strides = [1, 1]} : vector<2x256xf32> to vector<2x64xf32>
    %320 = vector.extract_strided_slice %308 {offsets = [0, 192], sizes = [2, 64], strides = [1, 1]} : vector<2x256xf32> to vector<2x64xf32>
    %cst_120 = arith.constant 5.000000e-01 : f32
    %321 = vector.broadcast %cst_120 : f32 to vector<2x64xf32>
    %322 = arith.mulf %320, %321 : vector<2x64xf32>
    %cst_121 = arith.constant 5.000000e-01 : f32
    %323 = vector.broadcast %cst_121 : f32 to vector<2x64xf32>
    %324 = arith.addf %322, %323 : vector<2x64xf32>
    %325 = arith.mulf %318, %269 : vector<2x64xf32>
    %326 = arith.mulf %313, %319 : vector<2x64xf32>
    %327 = arith.addf %325, %326 : vector<2x64xf32>
    %328 = math.tanh %327 : vector<2x64xf32>
    %329 = arith.mulf %324, %328 : vector<2x64xf32>
    %330 = arith.truncf %301 : vector<2x64xf32> to vector<2x64xbf16>
    %c0_122 = arith.constant 0 : index
    %c0_123 = arith.constant 0 : index
    %331 = vector.load %arg5[%c0_122, %c0_123] : memref<64x256xbf16, #tpu.memory_space<vmem>>, vector<64x256xbf16>
    %cst_124 = arith.constant dense<0.000000e+00> : vector<2x256xf32>
    %332 = tpu.matmul %330, %331, %cst_124 {dimension_numbers = #tpu.dot_dimension_numbers<[1], [0], [0], [1], [0, 0, 1, 1], [], []>} : vector<2x64xbf16>, vector<64x256xbf16>, vector<2x256xf32> -> vector<2x256xf32>
    %333 = arith.truncf %329 : vector<2x64xf32> to vector<2x64xbf16>
    %c0_125 = arith.constant 0 : index
    %c0_126 = arith.constant 0 : index
    %334 = vector.load %arg4[%c0_125, %c0_126] : memref<64x256xbf16, #tpu.memory_space<vmem>>, vector<64x256xbf16>
    %cst_127 = arith.constant dense<0.000000e+00> : vector<2x256xf32>
    %335 = tpu.matmul %333, %334, %cst_127 {dimension_numbers = #tpu.dot_dimension_numbers<[1], [0], [0], [1], [0, 0, 1, 1], [], []>} : vector<2x64xbf16>, vector<64x256xbf16>, vector<2x256xf32> -> vector<2x256xf32>
    %336 = arith.addf %335, %332 : vector<2x256xf32>
    %337 = arith.addf %336, %10 : vector<2x256xf32>
    %338 = math.tanh %337 : vector<2x256xf32>
    %339 = vector.extract_strided_slice %338 {offsets = [0, 0], sizes = [2, 64], strides = [1, 1]} : vector<2x256xf32> to vector<2x64xf32>
    %cst_128 = arith.constant 5.000000e-01 : f32
    %340 = vector.broadcast %cst_128 : f32 to vector<2x64xf32>
    %341 = arith.mulf %339, %340 : vector<2x64xf32>
    %cst_129 = arith.constant 5.000000e-01 : f32
    %342 = vector.broadcast %cst_129 : f32 to vector<2x64xf32>
    %343 = arith.addf %341, %342 : vector<2x64xf32>
    %344 = vector.extract_strided_slice %338 {offsets = [0, 64], sizes = [2, 64], strides = [1, 1]} : vector<2x256xf32> to vector<2x64xf32>
    %cst_130 = arith.constant 5.000000e-01 : f32
    %345 = vector.broadcast %cst_130 : f32 to vector<2x64xf32>
    %346 = arith.mulf %344, %345 : vector<2x64xf32>
    %cst_131 = arith.constant 5.000000e-01 : f32
    %347 = vector.broadcast %cst_131 : f32 to vector<2x64xf32>
    %348 = arith.addf %346, %347 : vector<2x64xf32>
    %349 = vector.extract_strided_slice %338 {offsets = [0, 128], sizes = [2, 64], strides = [1, 1]} : vector<2x256xf32> to vector<2x64xf32>
    %350 = vector.extract_strided_slice %338 {offsets = [0, 192], sizes = [2, 64], strides = [1, 1]} : vector<2x256xf32> to vector<2x64xf32>
    %cst_132 = arith.constant 5.000000e-01 : f32
    %351 = vector.broadcast %cst_132 : f32 to vector<2x64xf32>
    %352 = arith.mulf %350, %351 : vector<2x64xf32>
    %cst_133 = arith.constant 5.000000e-01 : f32
    %353 = vector.broadcast %cst_133 : f32 to vector<2x64xf32>
    %354 = arith.addf %352, %353 : vector<2x64xf32>
    %355 = arith.mulf %348, %299 : vector<2x64xf32>
    %356 = arith.mulf %343, %349 : vector<2x64xf32>
    %357 = arith.addf %355, %356 : vector<2x64xf32>
    %358 = math.tanh %357 : vector<2x64xf32>
    %359 = arith.mulf %354, %358 : vector<2x64xf32>
    %360 = vector.extract_strided_slice %7 {offsets = [0, 6, 0], sizes = [2, 1, 256], strides = [1, 1, 1]} : vector<2x8x256xf32> to vector<2x1x256xf32>
    %361 = vector.shape_cast %360 : vector<2x1x256xf32> to vector<2x256xf32>
    %362 = arith.truncf %329 : vector<2x64xf32> to vector<2x64xbf16>
    %c0_134 = arith.constant 0 : index
    %c0_135 = arith.constant 0 : index
    %363 = vector.load %arg2[%c0_134, %c0_135] : memref<64x256xbf16, #tpu.memory_space<vmem>>, vector<64x256xbf16>
    %cst_136 = arith.constant dense<0.000000e+00> : vector<2x256xf32>
    %364 = tpu.matmul %362, %363, %cst_136 {dimension_numbers = #tpu.dot_dimension_numbers<[1], [0], [0], [1], [0, 0, 1, 1], [], []>} : vector<2x64xbf16>, vector<64x256xbf16>, vector<2x256xf32> -> vector<2x256xf32>
    %365 = arith.addf %361, %364 : vector<2x256xf32>
    %366 = math.tanh %365 : vector<2x256xf32>
    %367 = vector.extract_strided_slice %366 {offsets = [0, 0], sizes = [2, 64], strides = [1, 1]} : vector<2x256xf32> to vector<2x64xf32>
    %cst_137 = arith.constant 5.000000e-01 : f32
    %368 = vector.broadcast %cst_137 : f32 to vector<2x64xf32>
    %369 = arith.mulf %367, %368 : vector<2x64xf32>
    %cst_138 = arith.constant 5.000000e-01 : f32
    %370 = vector.broadcast %cst_138 : f32 to vector<2x64xf32>
    %371 = arith.addf %369, %370 : vector<2x64xf32>
    %372 = vector.extract_strided_slice %366 {offsets = [0, 64], sizes = [2, 64], strides = [1, 1]} : vector<2x256xf32> to vector<2x64xf32>
    %cst_139 = arith.constant 5.000000e-01 : f32
    %373 = vector.broadcast %cst_139 : f32 to vector<2x64xf32>
    %374 = arith.mulf %372, %373 : vector<2x64xf32>
    %cst_140 = arith.constant 5.000000e-01 : f32
    %375 = vector.broadcast %cst_140 : f32 to vector<2x64xf32>
    %376 = arith.addf %374, %375 : vector<2x64xf32>
    %377 = vector.extract_strided_slice %366 {offsets = [0, 128], sizes = [2, 64], strides = [1, 1]} : vector<2x256xf32> to vector<2x64xf32>
    %378 = vector.extract_strided_slice %366 {offsets = [0, 192], sizes = [2, 64], strides = [1, 1]} : vector<2x256xf32> to vector<2x64xf32>
    %cst_141 = arith.constant 5.000000e-01 : f32
    %379 = vector.broadcast %cst_141 : f32 to vector<2x64xf32>
    %380 = arith.mulf %378, %379 : vector<2x64xf32>
    %cst_142 = arith.constant 5.000000e-01 : f32
    %381 = vector.broadcast %cst_142 : f32 to vector<2x64xf32>
    %382 = arith.addf %380, %381 : vector<2x64xf32>
    %383 = arith.mulf %376, %327 : vector<2x64xf32>
    %384 = arith.mulf %371, %377 : vector<2x64xf32>
    %385 = arith.addf %383, %384 : vector<2x64xf32>
    %386 = math.tanh %385 : vector<2x64xf32>
    %387 = arith.mulf %382, %386 : vector<2x64xf32>
    %388 = arith.truncf %359 : vector<2x64xf32> to vector<2x64xbf16>
    %c0_143 = arith.constant 0 : index
    %c0_144 = arith.constant 0 : index
    %389 = vector.load %arg5[%c0_143, %c0_144] : memref<64x256xbf16, #tpu.memory_space<vmem>>, vector<64x256xbf16>
    %cst_145 = arith.constant dense<0.000000e+00> : vector<2x256xf32>
    %390 = tpu.matmul %388, %389, %cst_145 {dimension_numbers = #tpu.dot_dimension_numbers<[1], [0], [0], [1], [0, 0, 1, 1], [], []>} : vector<2x64xbf16>, vector<64x256xbf16>, vector<2x256xf32> -> vector<2x256xf32>
    %391 = arith.truncf %387 : vector<2x64xf32> to vector<2x64xbf16>
    %c0_146 = arith.constant 0 : index
    %c0_147 = arith.constant 0 : index
    %392 = vector.load %arg4[%c0_146, %c0_147] : memref<64x256xbf16, #tpu.memory_space<vmem>>, vector<64x256xbf16>
    %cst_148 = arith.constant dense<0.000000e+00> : vector<2x256xf32>
    %393 = tpu.matmul %391, %392, %cst_148 {dimension_numbers = #tpu.dot_dimension_numbers<[1], [0], [0], [1], [0, 0, 1, 1], [], []>} : vector<2x64xbf16>, vector<64x256xbf16>, vector<2x256xf32> -> vector<2x256xf32>
    %394 = arith.addf %393, %390 : vector<2x256xf32>
    %395 = arith.addf %394, %10 : vector<2x256xf32>
    %396 = math.tanh %395 : vector<2x256xf32>
    %397 = vector.extract_strided_slice %396 {offsets = [0, 0], sizes = [2, 64], strides = [1, 1]} : vector<2x256xf32> to vector<2x64xf32>
    %cst_149 = arith.constant 5.000000e-01 : f32
    %398 = vector.broadcast %cst_149 : f32 to vector<2x64xf32>
    %399 = arith.mulf %397, %398 : vector<2x64xf32>
    %cst_150 = arith.constant 5.000000e-01 : f32
    %400 = vector.broadcast %cst_150 : f32 to vector<2x64xf32>
    %401 = arith.addf %399, %400 : vector<2x64xf32>
    %402 = vector.extract_strided_slice %396 {offsets = [0, 64], sizes = [2, 64], strides = [1, 1]} : vector<2x256xf32> to vector<2x64xf32>
    %cst_151 = arith.constant 5.000000e-01 : f32
    %403 = vector.broadcast %cst_151 : f32 to vector<2x64xf32>
    %404 = arith.mulf %402, %403 : vector<2x64xf32>
    %cst_152 = arith.constant 5.000000e-01 : f32
    %405 = vector.broadcast %cst_152 : f32 to vector<2x64xf32>
    %406 = arith.addf %404, %405 : vector<2x64xf32>
    %407 = vector.extract_strided_slice %396 {offsets = [0, 128], sizes = [2, 64], strides = [1, 1]} : vector<2x256xf32> to vector<2x64xf32>
    %408 = vector.extract_strided_slice %396 {offsets = [0, 192], sizes = [2, 64], strides = [1, 1]} : vector<2x256xf32> to vector<2x64xf32>
    %cst_153 = arith.constant 5.000000e-01 : f32
    %409 = vector.broadcast %cst_153 : f32 to vector<2x64xf32>
    %410 = arith.mulf %408, %409 : vector<2x64xf32>
    %cst_154 = arith.constant 5.000000e-01 : f32
    %411 = vector.broadcast %cst_154 : f32 to vector<2x64xf32>
    %412 = arith.addf %410, %411 : vector<2x64xf32>
    %413 = arith.mulf %406, %357 : vector<2x64xf32>
    %414 = arith.mulf %401, %407 : vector<2x64xf32>
    %415 = arith.addf %413, %414 : vector<2x64xf32>
    %416 = math.tanh %415 : vector<2x64xf32>
    %417 = arith.mulf %412, %416 : vector<2x64xf32>
    %418 = vector.extract_strided_slice %7 {offsets = [0, 7, 0], sizes = [2, 1, 256], strides = [1, 1, 1]} : vector<2x8x256xf32> to vector<2x1x256xf32>
    %419 = vector.shape_cast %418 : vector<2x1x256xf32> to vector<2x256xf32>
    %420 = arith.truncf %387 : vector<2x64xf32> to vector<2x64xbf16>
    %c0_155 = arith.constant 0 : index
    %c0_156 = arith.constant 0 : index
    %421 = vector.load %arg2[%c0_155, %c0_156] : memref<64x256xbf16, #tpu.memory_space<vmem>>, vector<64x256xbf16>
    %cst_157 = arith.constant dense<0.000000e+00> : vector<2x256xf32>
    %422 = tpu.matmul %420, %421, %cst_157 {dimension_numbers = #tpu.dot_dimension_numbers<[1], [0], [0], [1], [0, 0, 1, 1], [], []>} : vector<2x64xbf16>, vector<64x256xbf16>, vector<2x256xf32> -> vector<2x256xf32>
    %423 = arith.addf %419, %422 : vector<2x256xf32>
    %424 = math.tanh %423 : vector<2x256xf32>
    %425 = vector.extract_strided_slice %424 {offsets = [0, 0], sizes = [2, 64], strides = [1, 1]} : vector<2x256xf32> to vector<2x64xf32>
    %cst_158 = arith.constant 5.000000e-01 : f32
    %426 = vector.broadcast %cst_158 : f32 to vector<2x64xf32>
    %427 = arith.mulf %425, %426 : vector<2x64xf32>
    %cst_159 = arith.constant 5.000000e-01 : f32
    %428 = vector.broadcast %cst_159 : f32 to vector<2x64xf32>
    %429 = arith.addf %427, %428 : vector<2x64xf32>
    %430 = vector.extract_strided_slice %424 {offsets = [0, 64], sizes = [2, 64], strides = [1, 1]} : vector<2x256xf32> to vector<2x64xf32>
    %cst_160 = arith.constant 5.000000e-01 : f32
    %431 = vector.broadcast %cst_160 : f32 to vector<2x64xf32>
    %432 = arith.mulf %430, %431 : vector<2x64xf32>
    %cst_161 = arith.constant 5.000000e-01 : f32
    %433 = vector.broadcast %cst_161 : f32 to vector<2x64xf32>
    %434 = arith.addf %432, %433 : vector<2x64xf32>
    %435 = vector.extract_strided_slice %424 {offsets = [0, 128], sizes = [2, 64], strides = [1, 1]} : vector<2x256xf32> to vector<2x64xf32>
    %436 = vector.extract_strided_slice %424 {offsets = [0, 192], sizes = [2, 64], strides = [1, 1]} : vector<2x256xf32> to vector<2x64xf32>
    %cst_162 = arith.constant 5.000000e-01 : f32
    %437 = vector.broadcast %cst_162 : f32 to vector<2x64xf32>
    %438 = arith.mulf %436, %437 : vector<2x64xf32>
    %cst_163 = arith.constant 5.000000e-01 : f32
    %439 = vector.broadcast %cst_163 : f32 to vector<2x64xf32>
    %440 = arith.addf %438, %439 : vector<2x64xf32>
    %441 = arith.mulf %434, %385 : vector<2x64xf32>
    %442 = arith.mulf %429, %435 : vector<2x64xf32>
    %443 = arith.addf %441, %442 : vector<2x64xf32>
    %444 = math.tanh %443 : vector<2x64xf32>
    %445 = arith.mulf %440, %444 : vector<2x64xf32>
    %446 = arith.truncf %417 : vector<2x64xf32> to vector<2x64xbf16>
    %c0_164 = arith.constant 0 : index
    %c0_165 = arith.constant 0 : index
    %447 = vector.load %arg5[%c0_164, %c0_165] : memref<64x256xbf16, #tpu.memory_space<vmem>>, vector<64x256xbf16>
    %cst_166 = arith.constant dense<0.000000e+00> : vector<2x256xf32>
    %448 = tpu.matmul %446, %447, %cst_166 {dimension_numbers = #tpu.dot_dimension_numbers<[1], [0], [0], [1], [0, 0, 1, 1], [], []>} : vector<2x64xbf16>, vector<64x256xbf16>, vector<2x256xf32> -> vector<2x256xf32>
    %449 = arith.truncf %445 : vector<2x64xf32> to vector<2x64xbf16>
    %c0_167 = arith.constant 0 : index
    %c0_168 = arith.constant 0 : index
    %450 = vector.load %arg4[%c0_167, %c0_168] : memref<64x256xbf16, #tpu.memory_space<vmem>>, vector<64x256xbf16>
    %cst_169 = arith.constant dense<0.000000e+00> : vector<2x256xf32>
    %451 = tpu.matmul %449, %450, %cst_169 {dimension_numbers = #tpu.dot_dimension_numbers<[1], [0], [0], [1], [0, 0, 1, 1], [], []>} : vector<2x64xbf16>, vector<64x256xbf16>, vector<2x256xf32> -> vector<2x256xf32>
    %452 = arith.addf %451, %448 : vector<2x256xf32>
    %453 = arith.addf %452, %10 : vector<2x256xf32>
    %454 = math.tanh %453 : vector<2x256xf32>
    %455 = vector.extract_strided_slice %454 {offsets = [0, 0], sizes = [2, 64], strides = [1, 1]} : vector<2x256xf32> to vector<2x64xf32>
    %cst_170 = arith.constant 5.000000e-01 : f32
    %456 = vector.broadcast %cst_170 : f32 to vector<2x64xf32>
    %457 = arith.mulf %455, %456 : vector<2x64xf32>
    %cst_171 = arith.constant 5.000000e-01 : f32
    %458 = vector.broadcast %cst_171 : f32 to vector<2x64xf32>
    %459 = arith.addf %457, %458 : vector<2x64xf32>
    %460 = vector.extract_strided_slice %454 {offsets = [0, 64], sizes = [2, 64], strides = [1, 1]} : vector<2x256xf32> to vector<2x64xf32>
    %cst_172 = arith.constant 5.000000e-01 : f32
    %461 = vector.broadcast %cst_172 : f32 to vector<2x64xf32>
    %462 = arith.mulf %460, %461 : vector<2x64xf32>
    %cst_173 = arith.constant 5.000000e-01 : f32
    %463 = vector.broadcast %cst_173 : f32 to vector<2x64xf32>
    %464 = arith.addf %462, %463 : vector<2x64xf32>
    %465 = vector.extract_strided_slice %454 {offsets = [0, 128], sizes = [2, 64], strides = [1, 1]} : vector<2x256xf32> to vector<2x64xf32>
    %466 = vector.extract_strided_slice %454 {offsets = [0, 192], sizes = [2, 64], strides = [1, 1]} : vector<2x256xf32> to vector<2x64xf32>
    %cst_174 = arith.constant 5.000000e-01 : f32
    %467 = vector.broadcast %cst_174 : f32 to vector<2x64xf32>
    %468 = arith.mulf %466, %467 : vector<2x64xf32>
    %cst_175 = arith.constant 5.000000e-01 : f32
    %469 = vector.broadcast %cst_175 : f32 to vector<2x64xf32>
    %470 = arith.addf %468, %469 : vector<2x64xf32>
    %471 = arith.mulf %464, %415 : vector<2x64xf32>
    %472 = arith.mulf %459, %465 : vector<2x64xf32>
    %473 = arith.addf %471, %472 : vector<2x64xf32>
    %474 = math.tanh %473 : vector<2x64xf32>
    %475 = arith.mulf %470, %474 : vector<2x64xf32>
    %476 = arith.truncf %475 : vector<2x64xf32> to vector<2x64xbf16>
    %c0_176 = arith.constant 0 : index
    %c0_177 = arith.constant 0 : index
    %477 = vector.load %arg7[%c0_176, %c0_177] : memref<64x4xbf16, #tpu.memory_space<vmem>>, vector<64x4xbf16>
    %cst_178 = arith.constant dense<0.000000e+00> : vector<2x4xf32>
    %478 = tpu.matmul %476, %477, %cst_178 {dimension_numbers = #tpu.dot_dimension_numbers<[1], [0], [0], [1], [0, 0, 1, 1], [], []>} : vector<2x64xbf16>, vector<64x4xbf16>, vector<2x4xf32> -> vector<2x4xf32>
    %c0_179 = arith.constant 0 : index
    %c0_180 = arith.constant 0 : index
    %479 = vector.load %arg8[%c0_179, %c0_180] : memref<1x4xf32, #tpu.memory_space<vmem>>, vector<1x4xf32>
    %480 = vector.broadcast %479 : vector<1x4xf32> to vector<2x4xf32>
    %481 = arith.addf %478, %480 : vector<2x4xf32>
    %c0_181 = arith.constant 0 : index
    %c0_182 = arith.constant 0 : index
    %482 = vector.load %arg9[%c0_181, %c0_182] : memref<2x4xf32, #tpu.memory_space<vmem>>, vector<2x4xf32>
    tpu.vector_store %arg9[%c0_181, %c0_182], %481 {strides = array<i32>} : memref<2x4xf32, #tpu.memory_space<vmem>>, vector<2x4xf32>,
    return
  }
}

</mosaic_0001>

<bundles_post_ra>
// kernel: lstm_classifier_forward.1
= control target key start
LH: loop header
LB: loop body
LE: loop exit
PB: predicated region body
PF: predicated region fallthrough
CT: control target
= control target key end

     0   :  { %14 = vsyncpa [#allocation3], 0  ;;  %s3194_s0 = inlined_call_operand.hbm [shape: f32[16,30], index: 0, kind: input, shape index: {}]   ;;  %s3195_s1 = inlined_call_operand.vmem [shape: bf16[30,256], index: 1, kind: input, shape index: {}]   ;;  %s3196_s2 = inlined_call_operand.hbm [shape: bf16[64,256], index: 2, kind: input, shape index: {}]   ;;  %s3197_s3 = inlined_call_operand.vmem [shape: f32[1,256], index: 3, kind: input, shape index: {}]   ;;  %s3198_s4 = inlined_call_operand.hbm [shape: bf16[64,256], index: 4, kind: input, shape index: {}]   ;;  %s3199_s5 = inlined_call_operand.hbm [shape: bf16[64,256], index: 5, kind: input, shape index: {}]   ;;  %s3200_s6 = inlined_call_operand.vmem [shape: f32[1,256], index: 6, kind: input, shape index: {}]   ;;  %s3201_s7 = inlined_call_operand.vmem [shape: bf16[64,4], index: 7, kind: input, shape index: {}]   ;;  %s3202_s8 = inlined_call_operand.vmem [shape: f32[1,4], index: 8, kind: input, shape index: {}]   ;;  %s3203_s9 = inlined_call_operand.hbm [shape: f32[2,4], index: 9, kind: output, shape index: {}]  }
   0x1   :  { %15 = vsyncpa [#allocation6], 0 }
   0x2   :  { %16 = vsyncpa [#allocation9], 0 }
   0x3   :  { %17 = vsyncpa [#allocation4], 0  ;;  %s2531_s30 = smov [#allocation5]   ;;  %s2532_s11 = smov [#allocation2]  }
   0x4   :  { %s37_s10 = sshll.u32 %s2531_s30, 4  ;;  %s23_s12 = sshll.u32 %s2532_s11, 4  ;;  %s38_s10 = int_to_ptr.vmem [resolvable:$true] %s37_s10  ;;  %s24_s12 = int_to_ptr.vmem [resolvable:$true] %s23_s12 }
   0x5   :  { %s2431_s13 = scalar_lea.vmem %s38_s10, 1024  ;;  %p2436_p1 = scmp.lt.s32.totalorder %s38_s10, %s38_s10 }
   0x6   :  { %p2432_p0 = scmp.ne.s32.totalorder %s38_s10, %s2431_s13  ;;  %p2437_p2 = scmp.lt.s32.totalorder %s2431_s13, %s2431_s13 }
   0x8   :  { %p2438_p3 = por %p2437_p2, %p2436_p1 }
   0xa   :  { %p2439_p4 = pnand %p2438_p3, %p2432_p0 }
   0xc   :  { %2442 = shalt.err (!%p2439_p4)
}
   0xd   :  { %s2533_s14 = smov 128   ;;  %s2534_s15 = smov 8  }
   0xe   :  { %43 = dma.hbm_to_vmem [thread:$0]  %s3196_s2, 1024, %s38_s10, [#allocation6], %s2533_s14, %s2533_s14, %s2534_s15  }
   0xf   :  { %s2451_s18 = scalar_lea.vmem %s24_s12, 256  ;;  %p2456_p6 = scmp.lt.s32.totalorder %s24_s12, %s24_s12 }
  0x10   :  { %p2452_p5 = scmp.ne.s32.totalorder %s24_s12, %s2451_s18  ;;  %p2457_p7 = scmp.lt.s32.totalorder %s2451_s18, %s2451_s18 }
  0x12   :  { %p2458_p8 = por %p2457_p7, %p2456_p6 }
  0x14   :  { %p2459_p9 = pnand %p2458_p8, %p2452_p5 }
  0x16   :  { %2462 = shalt.err (!%p2459_p9)
}
  0x17   :  { %29 = dma.hbm_to_vmem [thread:$0]  %s3194_s0, 256, %s24_s12, [#allocation3], %s2533_s14, %s2533_s14, %s2534_s15  }
  0x18   :  { %s2535_s21 = smov [#allocation7]   ;;  %s2536_s23 = smov [#allocation8]  }
  0x19   :  { %s51_s22 = sshll.u32 %s2535_s21, 4  ;;  %s63_s24 = sshll.u32 %s2536_s23, 4  ;;  %s52_s22 = int_to_ptr.vmem [resolvable:$true] %s51_s22  ;;  %s64_s24 = int_to_ptr.vmem [resolvable:$true] %s63_s24 }
  0x1a   :  { %s2471_s2 = scalar_lea.vmem %s52_s22, 1024  ;;  %p2476_p11 = scmp.lt.s32.totalorder %s52_s22, %s52_s22 }
  0x1b   :  { %p2472_p10 = scmp.ne.s32.totalorder %s52_s22, %s2471_s2  ;;  %p2477_p12 = scmp.lt.s32.totalorder %s2471_s2, %s2471_s2 }
  0x1d   :  { %p2478_p13 = por %p2477_p12, %p2476_p11 }
  0x1f   :  { %p2479_p0 = pnand %p2478_p13, %p2472_p10 }
  0x21   :  { %2482 = shalt.err (!%p2479_p0)
}
  0x22   :  { %57 = dma.hbm_to_vmem [thread:$0]  %s3198_s4, 1024, %s52_s22, [#allocation6], %s2533_s14, %s2533_s14, %s2534_s15  }
  0x23   :  { %s2491_s0 = scalar_lea.vmem %s64_s24, 1024  ;;  %p2496_p2 = scmp.lt.s32.totalorder %s64_s24, %s64_s24 }
  0x24   :  { %p2492_p1 = scmp.ne.s32.totalorder %s64_s24, %s2491_s0  ;;  %p2497_p3 = scmp.lt.s32.totalorder %s2491_s0, %s2491_s0 }
  0x26   :  { %p2498_p4 = por %p2497_p3, %p2496_p2 }
  0x28   :  { %p2499_p5 = pnand %p2498_p4, %p2492_p1 }
  0x2a   :  { %2502 = shalt.err (!%p2499_p5)
}
  0x2b   :  { %69 = dma.hbm_to_vmem [thread:$0]  %s3199_s5, 1024, %s64_s24, [#allocation9], %s2533_s14, %s2533_s14, %s2534_s15  }
  0x2c   :  { %2523 = dma.done.wait [#allocation3], 256  }
  0x2d   :  { %2524 = vsyncadd [#allocation3], 4294967040 }
  0x2e   :  { %2525 = dma.done.wait [#allocation6], 2048  }
  0x2f   :  { %2526 = vsyncadd [#allocation6], 4294965248 }
  0x30   :  { %2527 = dma.done.wait [#allocation9], 1024  }
  0x31   :  { %2528 = vsyncadd [#allocation9], 4294966272  ;;  %v2537_v0 = vmov 0   ;;  %vm130_vm0 = vcmask 1046528   ;;  %v2621_v2 = vld [vmem:[#allocation5 + $0x34] ss:$8 sps:$4 sm:$0xff]   ;;  %v98_v17 = vlaneseq }
  0x32   :  { %169 = vmatprep.mubr.bf16.mxu0 %v2537_v0  ;;  %276 = vmatprep.mubr.bf16.mxu1 %v2537_v0  ;;  %v2209_v1 = vld [vmem:[%s3195_s1 + $0x14] ss:$8 sps:$4 sm:$0x7f]   ;;  %v2213_v3 = vld [vmem:[%s3195_s1 + $0x10] ss:$8 sps:$4 sm:$0x7f]  }
  0x33   :  { %2127 = vmatprep.subr.msk.bf16.mxu0 %vm130_vm0, %v2209_v1  ;;  %v2626_v4 = vld [vmem:[#allocation5 + $0x30] ss:$8 sps:$4 sm:$0xff]   ;;  %252 = vmatprep.subr.bf16.mxu1 %v2621_v2  ;;  %v2215_v5 = vld [vmem:[%s3195_s1 + $0x4] ss:$8 sps:$4 sm:$0xff]   ;;  %v132_v6 = vsel %vm130_vm0, %v2213_v3, 0  ;;  %vm126_vm1 = vcmask 244736  }
  0x34   :  { %253 = vmatpush1.bf16.msra.mxu1 %v2626_v4  ;;  %v2633_v7 = vld [vmem:[#allocation5 + $0x24] ss:$8 sps:$4 sm:$0xff]   ;;  %v2219_v8 = vld [vmem:[%s3195_s1] ss:$8 sps:$4 sm:$0xff]   ;;  %150 = vmatpush1.bf16.msra.mxu0 %v132_v6  ;;  %v2638_v9 = vld [vmem:[#allocation5 + $0x20] ss:$8 sps:$4 sm:$0xff]  }
  0x35   :  { %v89_v10 = vld [vmem:[#allocation2] sm:$0xff]  ;;  %v90_v11 = vld [vmem:[#allocation2 + $0x8] sm:$0xff]  ;;  %151 = vmatprep.subr.bf16.mxu0 %v2215_v5  ;;  %254 = vmatprep.subr.bf16.mxu1 %v2633_v7  ;;  %v2646_v15 = vld [vmem:[#allocation5 + $0x4] ss:$8 sps:$4 sm:$0xff]   ;;  %v2657_v18 = vshrl.u32 %v98_v17, 7  ;;  %vm431_vm2 = vcmask 1041409  }
  0x36   :  { %v2641_v12 = vld [vmem:[#allocation5 + $0x14] ss:$8 sps:$4 sm:$0xff]   ;;  %v91_v13 = vpack.c.bf16 %v90_v11, %v89_v10  ;;  %v2644_v14 = vld [vmem:[#allocation5 + $0x10] ss:$8 sps:$4 sm:$0xff]   ;;  %v2649_v16 = vld [vmem:[#allocation5] ss:$8 sps:$4 sm:$0xff]  }
  0x37   :  { %v100_v19 = vsub.s32 0, %v2657_v18  ;;  %v96_v20 = vld [vmem:[%s3197_s3] sm:$0x3]  ;;  %v104_v24 = vsub.s32 1, %v2657_v18  ;;  %s2538_s3 = smov 64   ;;  %vm240_vm3 = vcmask 523264  }
  0x38   :  { %255 = vmatpush1.bf16.msra.mxu1 %v2638_v9  ;;  %152 = vmatpush1.bf16.msra.mxu0 %v2219_v8  ;;  %v2682_v52 = vld [vmem:[#allocation8 + $0x34] ss:$8 sps:$4 sm:$0xff]   ;;  %v2684_v53 = vld [vmem:[#allocation8 + $0x30] ss:$8 sps:$4 sm:$0xff]   ;;  %v2686_v54 = vld [vmem:[#allocation8 + $0x24] ss:$8 sps:$4 sm:$0xff]  }
  0x39   :  { %256 = vmatprep.subr.bf16.mxu1 %v2641_v12  ;;  %v101_v22 = vrot.slane %v96_v20, %v100_v19  ;;  %v105_v29 = vrot.slane %v96_v20, %v104_v24  ;;  %383 = vmatprep.subr.bf16.mxu0 %v2682_v52  ;;  %v2689_v55 = vld [vmem:[#allocation7 + $0x34] ss:$8 sps:$4 sm:$0xff]   ;;  %v2692_v56 = vld [vmem:[#allocation8 + $0x20] ss:$8 sps:$4 sm:$0xff]   ;;  %v2694_v57 = vld [vmem:[#allocation7 + $0x30] ss:$8 sps:$4 sm:$0xff]  }
  0x3a   :  { %v2696_v58 = vld [vmem:[#allocation7 + $0x24] ss:$8 sps:$4 sm:$0xff]   ;;  %v2699_v59 = vld [vmem:[#allocation8 + $0x14] ss:$8 sps:$4 sm:$0xff]   ;;  %v2703_v60 = vld [vmem:[#allocation7 + $0x20] ss:$8 sps:$4 sm:$0xff]  }
  0x3b   :  { %2128 = vmatmul.mubr.msk.bf16.vlgmr.msra.gmra.mxu0 %vm126_vm1, %v91_v13  ;;  %v2706_v61 = vld [vmem:[#allocation7 + $0x14] ss:$8 sps:$4 sm:$0xff]   ;;  %v2709_v62 = vld [vmem:[#allocation8 + $0x10] ss:$8 sps:$4 sm:$0xff]   ;;  %v2712_v63 = vld [vmem:[#allocation8 + $0x4] ss:$8 sps:$4 sm:$0xff]  }
  0x3c   :  { %257 = vmatpush1.bf16.msra.mxu1 %v2644_v14  ;;  %407 = vmatprep.mubr.bf16.mxu0 %v2537_v0  ;;  %v2715_v1 = vld [vmem:[#allocation7 + $0x10] ss:$8 sps:$4 sm:$0xff]   ;;  %v2718_v3 = vld [vmem:[#allocation7 + $0x4] ss:$8 sps:$4 sm:$0xff]   ;;  %v2721_v5 = vld [vmem:[#allocation8] ss:$8 sps:$4 sm:$0xff]  }
  0x3d   :  { %258 = vmatprep.subr.bf16.mxu1 %v2646_v15  ;;  %384 = vmatpush1.bf16.msra.mxu0 %v2684_v53  ;;  %v2725_v6 = vld [vmem:[#allocation7] ss:$8 sps:$4 sm:$0xff]   ;;  %vm2540_vm4 = vmmov 0   ;;  %vm2104_vm5 = vcmask 25600  }
  0x3e   :  { %385 = vmatprep.subr.bf16.mxu0 %v2686_v54 }
  0x40   :  { %259 = vmatpush1.bf16.msra.mxu1 %v2649_v16 }
  0x41   :  { %487 = vmatprep.subr.bf16.mxu1 %v2689_v55  ;;  %386 = vmatpush1.bf16.msra.mxu0 %v2692_v56 }
  0x42   :  { %387 = vmatprep.subr.bf16.mxu0 %v2699_v59 }
  0x43   :  { %277 = vmatmul.mubr.bf16.vlgmr.msra.gmra.mxu1 %v2537_v0 }
  0x44   :  { %511 = vmatprep.mubr.bf16.mxu1 %v2537_v0  ;;  %488 = vmatpush1.bf16.msra.mxu1 %v2694_v57 }
  0x45   :  { %489 = vmatprep.subr.bf16.mxu1 %v2696_v58  ;;  %388 = vmatpush1.bf16.msra.mxu0 %v2709_v62 }
  0x46   :  { %389 = vmatprep.subr.bf16.mxu0 %v2712_v63 }
  0x48   :  { %490 = vmatpush1.bf16.msra.mxu1 %v2703_v60 }
  0x49   :  { %491 = vmatprep.subr.bf16.mxu1 %v2706_v61  ;;  %390 = vmatpush1.bf16.msra.mxu0 %v2721_v5 }
  0x4a   :  { %545 = vmatprep.subr.bf16.mxu0 %v2621_v2 }
  0x4c   :  { %492 = vmatpush1.bf16.msra.mxu1 %v2715_v1  ;;  %408 = vmatmul.mubr.bf16.vlgmr.msra.gmra.mxu0 %v2537_v0 }
  0x4d   :  { %493 = vmatprep.subr.bf16.mxu1 %v2718_v3  ;;  %546 = vmatpush1.bf16.msra.mxu0 %v2626_v4 }
  0x4e   :  { %569 = vmatprep.mubr.bf16.mxu0 %v2537_v0  ;;  %547 = vmatprep.subr.bf16.mxu0 %v2633_v7 }
  0x50   :  { %494 = vmatpush1.bf16.msra.mxu1 %v2725_v6 }
  0x51   :  { %641 = vmatprep.subr.bf16.mxu1 %v2682_v52  ;;  %548 = vmatpush1.bf16.msra.mxu0 %v2638_v9 }
  0x52   :  { %549 = vmatprep.subr.bf16.mxu0 %v2641_v12 }
  0x55   :  { %550 = vmatpush1.bf16.msra.mxu0 %v2644_v14 }
  0x56   :  { %551 = vmatprep.subr.bf16.mxu0 %v2646_v15 }
  0x59   :  { %552 = vmatpush1.bf16.msra.mxu0 %v2649_v16 }
  0x5a   :  { %696 = vmatprep.subr.bf16.mxu0 %v2689_v55 }
  0xfb   :  { %v171_v21 = vpop.f32.mrf.mxu0 }
  0xfc   :  { %v2666_v26 = vadd.f32 %v171_v21, %v101_v22 }
  0xfd   :  { %v173_v23 = vpop.f32.mrf.mxu0 }
  0xfe   :  { %v2677_v40 = vadd.f32 %v173_v23, %v105_v29 }
  0xff   :  { %v175_v25 = vpop.f32.mrf.mxu0 }
 0x100   :  { %v2670_v30 = vadd.f32 %v175_v25, %v101_v22 }
 0x101   :  { %v177_v27 = vpop.f32.mrf.mxu0 }
 0x102   :  { %v2673_v34 = vadd.f32 %v177_v27, %v105_v29 }
 0x103   :  { %v278_v28 = vpop.f32.mrf.mxu1 }
 0x104   :  { %v287_v31 = vrot.slane %v278_v28, 1  ;;  %v293_v32 = vadd.f32 %v278_v28, %v2666_v26 }
 0x105   :  { %v280_v33 = vpop.f32.mrf.mxu1 }
 0x106   :  { %v295_v35 = vadd.f32 %v287_v31, %v2670_v30  ;;  %2255 = vtanh.f32 %v293_v32  ;;  %v288_v36 = vrot.slane %v280_v33, 1  ;;  %v294_v41 = vadd.f32 %v280_v33, %v2677_v40 }
 0x107   :  { %v282_v37 = vpop.f32.mrf.mxu1 }
 0x108   :  { %2257 = vtanh.f32 %v295_v35  ;;  %v296_v38 = vadd.f32 %v288_v36, %v2673_v34 }
 0x109   :  { %v283_v39 = vpop.f32.mrf.mxu1 }
 0x10a   :  { %2259 = vtanh.f32 %v296_v38 }
 0x10b   :  { %2261 = vtanh.f32 %v294_v41 }
 0x10c   :  { %v409_v41 = vpop.f32.mrf.mxu0 }
 0x113   :  { %v2256_v42 = vpop.eup %2255 }
 0x114   :  { %v301_v44 = vmul.f32 0.5, %v2256_v42  ;;  %v411_v42 = vpop.f32.mrf.mxu0 }
 0x115   :  { %v2258_v43 = vpop.eup %2257 }
 0x116   :  { %v302_v45 = vmul.f32 0.5, %v2258_v43  ;;  %v303_v49 = vadd.f32 0.5, %v301_v44  ;;  %v413_v43 = vpop.f32.mrf.mxu0 }
 0x117   :  { %v2260_v47 = vpop.eup %2259 }
 0x118   :  { %v304_v46 = vadd.f32 0.5, %v302_v45  ;;  %v2262_v50 = vpop.eup %2261  ;;  %v309_v13 = vmul.f32 0.0, %v303_v49  ;;  %v306_v21 = vmul.f32 0.5, %v2260_v47  ;;  %v414_v44 = vpop.f32.mrf.mxu0 }
 0x119   :  { %v311_v51 = vmul.f32 %v2262_v50, %v303_v49  ;;  %v305_v22 = vmul.f32 0.5, %v2262_v50 }
 0x11a   :  { %v312_v48 = vmul.f32 %v2260_v47, %v304_v46  ;;  %v310_v8 = vmul.f32 0.0, %v304_v46  ;;  %v308_v23 = vadd.f32 0.5, %v306_v21  ;;  %v180_v46 = vld [vmem:[%s3200_s6] sm:$0x3] }
 0x11b   :  { %v307_v28 = vadd.f32 0.5, %v305_v22  ;;  %v2775_v47 = vrot.slane %v180_v46, %v100_v19  ;;  %v2779_v50 = vrot.slane %v180_v46, %v104_v24 }
 0x11c   :  { %317 = vrot.lane.b32.xlu0 %v312_v48, %s2538_s3 }
 0x120   :  { %315 = vrot.lane.b32.xlu0 %v311_v51, %s2538_s3 }
 0x18e   :  { %v318_v10 = vpop.permute.xlu0 %317 }
 0x18f   :  { %v2742_v11 = vadd.f32 %v318_v10, %v310_v8 }
 0x191   :  { %2263 = vtanh.f32 %v2742_v11 }
 0x192   :  { %v316_v17 = vpop.permute.xlu0 %315 }
 0x193   :  { %v2745_v20 = vadd.f32 %v316_v17, %v309_v13 }
 0x195   :  { %2265 = vtanh.f32 %v2745_v20 }
 0x19e   :  { %v2264_v25 = vpop.eup %2263 }
 0x19f   :  { %v326_v27 = vmul.f32 %v2264_v25, %v308_v23 }
 0x1a1   :  { %v417_v29 = vpack.c.bf16 %v326_v27, %v326_v27 }
 0x1a2   :  { %v2266_v31 = vpop.eup %2265 }
 0x1a3   :  { %v325_v32 = vmul.f32 %v2266_v31, %v307_v28  ;;  %v429_v33 = vunpack.c.l.b16 %v417_v29 }
 0x1a5   :  { %v416_v35 = vpack.c.bf16 %v325_v32, %v325_v32  ;;  %v430_v37 = vrot.slane %v429_v33, 7 }
 0x1a7   :  { %v428_v36 = vunpack.c.l.b16 %v416_v35 }
 0x1a9   :  { %v432_v38 = vsel %vm431_vm2, %v430_v37, %v428_v36  ;;  %v605_v37 = vrot.slane %v2742_v11, 7 }
 0x1aa   :  { %v433_v39 = vpack.c.b16 %v432_v38, %v432_v38 }
 0x1ac   :  { %434 = vrot.lane.b32.xlu1 %v433_v39, %s2538_s3 }
 0x21e   :  { %v435_v45 = vpop.permute.xlu1 %434 }
 0x21f   :  { %2153 = vmatmul.mubr.msk.bf16.vlgmr.msra.gmra.mxu1 %vm240_vm3, %v435_v45  ;;  %2154 = vmatmul.mubr.msk.bf16.vlgmr.msra.gmra.mxu0 %vm240_vm3, %v435_v45  ;;  %v604_v45 = vrot.slane %v2745_v20, 7 }
 0x220   :  { %642 = vmatpush1.bf16.msra.mxu1 %v2684_v53  ;;  %697 = vmatpush1.bf16.msra.mxu0 %v2694_v57 }
 0x221   :  { %643 = vmatprep.subr.bf16.mxu1 %v2686_v54  ;;  %698 = vmatprep.subr.bf16.mxu0 %v2696_v58 }
 0x222   :  { %665 = vmatprep.mubr.bf16.mxu1 %v2537_v0  ;;  %720 = vmatprep.mubr.bf16.mxu0 %v2537_v0 }
 0x224   :  { %644 = vmatpush1.bf16.msra.mxu1 %v2692_v56  ;;  %699 = vmatpush1.bf16.msra.mxu0 %v2703_v60 }
 0x225   :  { %645 = vmatprep.subr.bf16.mxu1 %v2699_v59  ;;  %700 = vmatprep.subr.bf16.mxu0 %v2706_v61 }
 0x228   :  { %646 = vmatpush1.bf16.msra.mxu1 %v2709_v62  ;;  %701 = vmatpush1.bf16.msra.mxu0 %v2715_v1 }
 0x229   :  { %647 = vmatprep.subr.bf16.mxu1 %v2712_v63  ;;  %702 = vmatprep.subr.bf16.mxu0 %v2718_v3 }
 0x22c   :  { %648 = vmatpush1.bf16.msra.mxu1 %v2721_v5  ;;  %703 = vmatpush1.bf16.msra.mxu0 %v2725_v6 }
 0x22d   :  { %754 = vmatprep.subr.bf16.mxu1 %v2621_v2  ;;  %852 = vmatprep.subr.bf16.mxu0 %v2682_v52 }
 0x2df   :  { %v513_v48 = vpop.f32.mrf.mxu1  ;;  %v571_v49 = vpop.f32.mrf.mxu0 }
 0x2e0   :  { %v514_v51 = vadd.f32 %v513_v48, %v409_v41  ;;  %v580_v8 = vrot.slane %v571_v49, 7  ;;  %v588_v10 = vadd.f32 %v571_v49, %v2670_v30 }
 0x2e1   :  { %v515_v13 = vpop.f32.mrf.mxu1  ;;  %v573_v17 = vpop.f32.mrf.mxu0 }
 0x2e2   :  { %v520_v21 = vadd.f32 %v514_v51, %v2775_v47  ;;  %v586_v22 = vadd.f32 %v580_v8, %v2666_v26  ;;  %2267 = vtanh.f32 %v588_v10  ;;  %v516_v23 = vadd.f32 %v515_v13, %v411_v42 }
 0x2e3   :  { %v581_v19 = vrot.slane %v573_v17, 7  ;;  %v517_v25 = vpop.f32.mrf.mxu1  ;;  %v575_v27 = vpop.f32.mrf.mxu0  ;;  %v589_v31 = vadd.f32 %v573_v17, %v2673_v34 }
 0x2e4   :  { %2269 = vtanh.f32 %v520_v21  ;;  %v521_v18 = vadd.f32 %v516_v23, %v2779_v50 }
 0x2e5   :  { %2271 = vtanh.f32 %v586_v22  ;;  %v587_v24 = vadd.f32 %v581_v19, %v2677_v40  ;;  %v518_v28 = vpop.f32.mrf.mxu1  ;;  %v576_v29 = vpop.f32.mrf.mxu0 }
 0x2e6   :  { %2273 = vtanh.f32 %v521_v18 }
 0x2e7   :  { %2275 = vtanh.f32 %v587_v24 }
 0x2e8   :  { %2277 = vtanh.f32 %v589_v31 }
 0x2ef   :  { %v2268_v32 = vpop.eup %2267 }
 0x2f0   :  { %v595_v33 = vmul.f32 0.5, %v2268_v32 }
 0x2f1   :  { %v2270_v35 = vpop.eup %2269 }
 0x2f2   :  { %v2272_v36 = vpop.eup %2271  ;;  %v524_v38 = vmul.f32 0.5, %v2270_v35  ;;  %v597_v39 = vadd.f32 0.5, %v595_v33 }
 0x2f3   :  { %v594_v41 = vmul.f32 0.5, %v2272_v36  ;;  %v2274_v44 = vpop.eup %2273 }
 0x2f4   :  { %v525_v42 = vadd.f32 0.5, %v524_v38  ;;  %v609_v43 = vmul.f32 %v605_v37, %v597_v39  ;;  %v2276_v48 = vpop.eup %2275  ;;  %v526_v25 = vmul.f32 0.5, %v2274_v44 }
 0x2f5   :  { %v596_v46 = vadd.f32 0.5, %v594_v41  ;;  %v2278_v10 = vpop.eup %2277  ;;  %v598_v27 = vmul.f32 0.5, %v2276_v48 }
 0x2f6   :  { %v529_v49 = vmul.f32 %v2274_v44, %v525_v42  ;;  %v611_v13 = vmul.f32 %v2278_v10, %v597_v39  ;;  %v528_v11 = vmul.f32 0.0, %v525_v42  ;;  %v527_v18 = vadd.f32 0.5, %v526_v25 }
 0x2f7   :  { %v610_v51 = vmul.f32 %v2276_v48, %v596_v46  ;;  %v608_v8 = vmul.f32 %v604_v45, %v596_v46  ;;  %v599_v24 = vmul.f32 0.5, %v2278_v10  ;;  %v600_v29 = vadd.f32 0.5, %v598_v27 }
 0x2f8   :  { %531 = vrot.lane.b32.xlu1 %v529_v49, %s2538_s3 }
 0x2f9   :  { %614 = vrot.lane.b32.xlu0 %v610_v51, %s2538_s3  ;;  %v601_v36 = vadd.f32 0.5, %v599_v24 }
 0x2fc   :  { %616 = vrot.lane.b32.xlu1 %v611_v13, %s2538_s3 }
 0x36a   :  { %v532_v17 = vpop.permute.xlu1 %531 }
 0x36b   :  { %v615_v21 = vpop.permute.xlu0 %614  ;;  %v2792_v22 = vadd.f32 %v532_v17, %v528_v11 }
 0x36c   :  { %v2794_v23 = vadd.f32 %v615_v21, %v608_v8 }
 0x36d   :  { %2279 = vtanh.f32 %v2792_v22 }
 0x36e   :  { %2281 = vtanh.f32 %v2794_v23  ;;  %v617_v20 = vpop.permute.xlu1 %616 }
 0x36f   :  { %v2798_v19 = vadd.f32 %v617_v20, %v609_v43 }
 0x371   :  { %2283 = vtanh.f32 %v2798_v19 }
 0x37a   :  { %v2280_v28 = vpop.eup %2279 }
 0x37b   :  { %v2282_v31 = vpop.eup %2281  ;;  %v536_v32 = vmul.f32 %v2280_v28, %v527_v18 }
 0x37c   :  { %v624_v33 = vmul.f32 %v2282_v31, %v600_v29 }
 0x37d   :  { %v626_v35 = vpack.c.bf16 %v536_v32, %v536_v32 }
 0x37e   :  { %v2284_v37 = vpop.eup %2283  ;;  %v674_v38 = vpack.c.bf16 %v624_v33, %v624_v33 }
 0x37f   :  { %628 = vrot.lane.b32.xlu0 %v626_v35, %s2538_s3  ;;  %v625_v39 = vmul.f32 %v2284_v37, %v601_v36 }
 0x380   :  { %v678_v41 = vunpack.c.l.b16 %v674_v38 }
 0x381   :  { %v675_v42 = vpack.c.bf16 %v625_v39, %v625_v39 }
 0x382   :  { %v680_v45 = vrot.slane %v678_v41, 1 }
 0x383   :  { %v679_v43 = vunpack.c.l.b16 %v675_v42 }
 0x385   :  { %v681_v44 = vsel %vm431_vm2, %v679_v43, %v680_v45 }
 0x386   :  { %v682_v46 = vpack.c.b16 %v681_v44, %v681_v44 }
 0x388   :  { %683 = vrot.lane.b32.xlu1 %v682_v46, %s2538_s3 }
 0x3f1   :  { %v629_v48 = vpop.permute.xlu0 %628 }
 0x3f2   :  { %2155 = vmatmul.mubr.msk.bf16.vlgmr.msra.gmra.mxu1 %vm240_vm3, %v629_v48 }
 0x3f3   :  { %755 = vmatpush1.bf16.msra.mxu1 %v2626_v4  ;;  %778 = vmatprep.mubr.bf16.mxu1 %v2537_v0 }
 0x3f4   :  { %756 = vmatprep.subr.bf16.mxu1 %v2633_v7 }
 0x3f7   :  { %757 = vmatpush1.bf16.msra.mxu1 %v2638_v9 }
 0x3f8   :  { %758 = vmatprep.subr.bf16.mxu1 %v2641_v12 }
 0x3fa   :  { %v684_v49 = vpop.permute.xlu1 %683 }
 0x3fb   :  { %759 = vmatpush1.bf16.msra.mxu1 %v2644_v14  ;;  %2156 = vmatmul.mubr.msk.bf16.vlgmr.msra.gmra.mxu0 %vm240_vm3, %v684_v49 }
 0x3fc   :  { %760 = vmatprep.subr.bf16.mxu1 %v2646_v15  ;;  %853 = vmatpush1.bf16.msra.mxu0 %v2684_v53 }
 0x3fd   :  { %854 = vmatprep.subr.bf16.mxu0 %v2686_v54  ;;  %876 = vmatprep.mubr.bf16.mxu0 %v2537_v0 }
 0x3ff   :  { %761 = vmatpush1.bf16.msra.mxu1 %v2649_v16 }
 0x400   :  { %855 = vmatpush1.bf16.msra.mxu0 %v2692_v56  ;;  %908 = vmatprep.subr.bf16.mxu1 %v2689_v55 }
 0x401   :  { %856 = vmatprep.subr.bf16.mxu0 %v2699_v59 }
 0x402   :  { %2157 = vmatmul.mubr.msk.bf16.vlgmr.msra.gmra.mxu1 %vm240_vm3, %v684_v49 }
 0x403   :  { %909 = vmatpush1.bf16.msra.mxu1 %v2694_v57  ;;  %932 = vmatprep.mubr.bf16.mxu1 %v2537_v0 }
 0x404   :  { %857 = vmatpush1.bf16.msra.mxu0 %v2709_v62  ;;  %910 = vmatprep.subr.bf16.mxu1 %v2696_v58 }
 0x405   :  { %858 = vmatprep.subr.bf16.mxu0 %v2712_v63 }
 0x407   :  { %911 = vmatpush1.bf16.msra.mxu1 %v2703_v60 }
 0x408   :  { %859 = vmatpush1.bf16.msra.mxu0 %v2721_v5  ;;  %912 = vmatprep.subr.bf16.mxu1 %v2706_v61 }
 0x409   :  { %966 = vmatprep.subr.bf16.mxu0 %v2621_v2 }
 0x40b   :  { %913 = vmatpush1.bf16.msra.mxu1 %v2715_v1 }
 0x40c   :  { %914 = vmatprep.subr.bf16.mxu1 %v2718_v3 }
 0x40f   :  { %915 = vmatpush1.bf16.msra.mxu1 %v2725_v6 }
 0x410   :  { %1064 = vmatprep.subr.bf16.mxu1 %v2682_v52 }
 0x4b2   :  { %v667_v51 = vpop.f32.mrf.mxu1 }
 0x4b4   :  { %v669_v8 = vpop.f32.mrf.mxu1 }
 0x4b6   :  { %v671_v10 = vpop.f32.mrf.mxu1 }
 0x4b8   :  { %v672_v13 = vpop.f32.mrf.mxu1 }
 0x4b9   :  { %v815_v13 = vrot.slane %v2794_v23, 7 }
 0x4bb   :  { %v722_v11 = vpop.f32.mrf.mxu0 }
 0x4bc   :  { %v723_v17 = vadd.f32 %v722_v11, %v667_v51 }
 0x4bd   :  { %v724_v21 = vpop.f32.mrf.mxu0 }
 0x4be   :  { %v729_v20 = vadd.f32 %v723_v17, %v2775_v47  ;;  %v725_v25 = vadd.f32 %v724_v21, %v669_v8  ;;  %v816_v21 = vrot.slane %v2798_v19, 7 }
 0x4bf   :  { %v726_v27 = vpop.f32.mrf.mxu0 }
 0x4c0   :  { %2285 = vtanh.f32 %v729_v20  ;;  %v730_v18 = vadd.f32 %v725_v25, %v2779_v50 }
 0x4c1   :  { %v727_v24 = vpop.f32.mrf.mxu0 }
 0x4c2   :  { %v780_v28 = vpop.f32.mrf.mxu1  ;;  %2287 = vtanh.f32 %v730_v18 }
 0x4c3   :  { %v789_v29 = vrot.slane %v780_v28, 6  ;;  %v791_v31 = vrot.slane %v780_v28, 7 }
 0x4c4   :  { %v782_v32 = vpop.f32.mrf.mxu1 }
 0x4c5   :  { %v797_v33 = vadd.f32 %v789_v29, %v2666_v26  ;;  %v799_v35 = vadd.f32 %v791_v31, %v2670_v30  ;;  %v790_v36 = vrot.slane %v782_v32, 6  ;;  %v792_v37 = vrot.slane %v782_v32, 7 }
 0x4c6   :  { %v784_v38 = vpop.f32.mrf.mxu1 }
 0x4c7   :  { %2289 = vtanh.f32 %v797_v33  ;;  %v798_v39 = vadd.f32 %v790_v36, %v2677_v40  ;;  %v800_v41 = vadd.f32 %v792_v37, %v2673_v34 }
 0x4c8   :  { %2291 = vtanh.f32 %v799_v35  ;;  %v785_v42 = vpop.f32.mrf.mxu1 }
 0x4c9   :  { %2293 = vtanh.f32 %v798_v39 }
 0x4ca   :  { %2295 = vtanh.f32 %v800_v41 }
 0x4cd   :  { %v2286_v43 = vpop.eup %2285 }
 0x4ce   :  { %v733_v45 = vmul.f32 0.5, %v2286_v43 }
 0x4cf   :  { %v2288_v46 = vpop.eup %2287 }
 0x4d0   :  { %v734_v44 = vadd.f32 0.5, %v733_v45  ;;  %v735_v36 = vmul.f32 0.5, %v2288_v46 }
 0x4d2   :  { %v738_v48 = vmul.f32 %v2288_v46, %v734_v44  ;;  %v737_v29 = vmul.f32 %v734_v44, %v2792_v22  ;;  %v736_v37 = vadd.f32 0.5, %v735_v36 }
 0x4d4   :  { %v2290_v49 = vpop.eup %2289  ;;  %740 = vrot.lane.b32.xlu0 %v738_v48, %s2538_s3 }
 0x4d5   :  { %v2292_v51 = vpop.eup %2291  ;;  %v805_v8 = vmul.f32 0.5, %v2290_v49 }
 0x4d6   :  { %v806_v10 = vmul.f32 0.5, %v2292_v51  ;;  %v2294_v17 = vpop.eup %2293 }
 0x4d7   :  { %v807_v11 = vadd.f32 0.5, %v805_v8  ;;  %v2296_v25 = vpop.eup %2295  ;;  %v809_v22 = vmul.f32 0.5, %v2294_v17 }
 0x4d8   :  { %v808_v20 = vadd.f32 0.5, %v806_v10  ;;  %v810_v42 = vmul.f32 0.5, %v2296_v25 }
 0x4d9   :  { %v821_v27 = vmul.f32 %v2294_v17, %v807_v11  ;;  %v819_v18 = vmul.f32 %v815_v13, %v807_v11  ;;  %v811_v43 = vadd.f32 0.5, %v809_v22 }
 0x4da   :  { %v822_v24 = vmul.f32 %v2296_v25, %v808_v20  ;;  %v820_v28 = vmul.f32 %v816_v21, %v808_v20  ;;  %v812_v44 = vadd.f32 0.5, %v810_v42 }
 0x4db   :  { %825 = vrot.lane.b32.xlu1 %v821_v27, %s2538_s3 }
 0x4dc   :  { %827 = vrot.lane.b32.xlu0 %v822_v24, %s2538_s3 }
 0x546   :  { %v741_v31 = vpop.permute.xlu0 %740 }
 0x547   :  { %v2846_v32 = vadd.f32 %v741_v31, %v737_v29 }
 0x549   :  { %2297 = vtanh.f32 %v2846_v32 }
 0x54d   :  { %v826_v23 = vpop.permute.xlu1 %825 }
 0x54e   :  { %v828_v33 = vpop.permute.xlu0 %827  ;;  %v2849_v19 = vadd.f32 %v826_v23, %v819_v18 }
 0x54f   :  { %v2851_v35 = vadd.f32 %v828_v33, %v820_v28 }
 0x550   :  { %2299 = vtanh.f32 %v2849_v19 }
 0x551   :  { %2301 = vtanh.f32 %v2851_v35 }
 0x556   :  { %v2298_v38 = vpop.eup %2297 }
 0x557   :  { %v745_v39 = vmul.f32 %v2298_v38, %v736_v37 }
 0x559   :  { %v837_v41 = vpack.c.bf16 %v745_v39, %v745_v39 }
 0x55b   :  { %839 = vrot.lane.b32.xlu1 %v837_v41, %s2538_s3 }
 0x55d   :  { %v2300_v45 = vpop.eup %2299 }
 0x55e   :  { %v2302_v48 = vpop.eup %2301  ;;  %v835_v49 = vmul.f32 %v2300_v45, %v811_v43 }
 0x55f   :  { %v836_v51 = vmul.f32 %v2302_v48, %v812_v44 }
 0x560   :  { %v885_v8 = vpack.c.bf16 %v835_v49, %v835_v49 }
 0x561   :  { %v886_v10 = vpack.c.bf16 %v836_v51, %v836_v51 }
 0x562   :  { %v889_v13 = vunpack.c.l.b16 %v885_v8 }
 0x563   :  { %v890_v11 = vunpack.c.l.b16 %v886_v10 }
 0x564   :  { %v891_v21 = vrot.slane %v889_v13, 2 }
 0x565   :  { %v892_v46 = vrot.slane %v890_v11, 1 }
 0x567   :  { %v893_v20 = vsel %vm431_vm2, %v892_v46, %v891_v21 }
 0x568   :  { %v894_v27 = vpack.c.b16 %v893_v20, %v893_v20 }
 0x56a   :  { %895 = vrot.lane.b32.xlu0 %v894_v27, %s2538_s3 }
 0x5cd   :  { %v840_v17 = vpop.permute.xlu1 %839 }
 0x5ce   :  { %2158 = vmatmul.mubr.msk.bf16.vlgmr.msra.gmra.mxu0 %vm240_vm3, %v840_v17 }
 0x5cf   :  { %967 = vmatpush1.bf16.msra.mxu0 %v2626_v4  ;;  %990 = vmatprep.mubr.bf16.mxu0 %v2537_v0 }
 0x5d0   :  { %968 = vmatprep.subr.bf16.mxu0 %v2633_v7 }
 0x5d3   :  { %969 = vmatpush1.bf16.msra.mxu0 %v2638_v9 }
 0x5d4   :  { %970 = vmatprep.subr.bf16.mxu0 %v2641_v12 }
 0x5d7   :  { %971 = vmatpush1.bf16.msra.mxu0 %v2644_v14 }
 0x5d8   :  { %972 = vmatprep.subr.bf16.mxu0 %v2646_v15 }
 0x5db   :  { %973 = vmatpush1.bf16.msra.mxu0 %v2649_v16 }
 0x5dc   :  { %v896_v25 = vpop.permute.xlu0 %895  ;;  %1120 = vmatprep.subr.bf16.mxu0 %v2689_v55 }
 0x5dd   :  { %2159 = vmatmul.mubr.msk.bf16.vlgmr.msra.gmra.mxu1 %vm240_vm3, %v896_v25 }
 0x5de   :  { %2160 = vmatmul.mubr.msk.bf16.vlgmr.msra.gmra.mxu0 %vm240_vm3, %v896_v25  ;;  %1065 = vmatpush1.bf16.msra.mxu1 %v2684_v53  ;;  %v1027_v25 = vrot.slane %v2849_v19, 7 }
 0x5df   :  { %1066 = vmatprep.subr.bf16.mxu1 %v2686_v54  ;;  %1121 = vmatpush1.bf16.msra.mxu0 %v2694_v57 }
 0x5e0   :  { %1088 = vmatprep.mubr.bf16.mxu1 %v2537_v0  ;;  %1122 = vmatprep.subr.bf16.mxu0 %v2696_v58 }
 0x5e1   :  { %1144 = vmatprep.mubr.bf16.mxu0 %v2537_v0 }
 0x5e2   :  { %1067 = vmatpush1.bf16.msra.mxu1 %v2692_v56 }
 0x5e3   :  { %1068 = vmatprep.subr.bf16.mxu1 %v2699_v59  ;;  %1123 = vmatpush1.bf16.msra.mxu0 %v2703_v60 }
 0x5e4   :  { %1124 = vmatprep.subr.bf16.mxu0 %v2706_v61 }
 0x5e6   :  { %1069 = vmatpush1.bf16.msra.mxu1 %v2709_v62 }
 0x5e7   :  { %1070 = vmatprep.subr.bf16.mxu1 %v2712_v63  ;;  %1125 = vmatpush1.bf16.msra.mxu0 %v2715_v1 }
 0x5e8   :  { %1126 = vmatprep.subr.bf16.mxu0 %v2718_v3 }
 0x5ea   :  { %1071 = vmatpush1.bf16.msra.mxu1 %v2721_v5 }
 0x5eb   :  { %1178 = vmatprep.subr.bf16.mxu1 %v2621_v2  ;;  %1127 = vmatpush1.bf16.msra.mxu0 %v2725_v6 }
 0x5ec   :  { %1276 = vmatprep.subr.bf16.mxu0 %v2682_v52 }
 0x68e   :  { %v878_v4 = vpop.f32.mrf.mxu0 }
 0x690   :  { %v880_v18 = vpop.f32.mrf.mxu0 }
 0x692   :  { %v882_v24 = vpop.f32.mrf.mxu0 }
 0x694   :  { %v883_v28 = vpop.f32.mrf.mxu0 }
 0x69d   :  { %v934_v29 = vpop.f32.mrf.mxu1 }
 0x69e   :  { %v935_v31 = vadd.f32 %v934_v29, %v878_v4  ;;  %v992_v23 = vpop.f32.mrf.mxu0  ;;  %v1028_v29 = vrot.slane %v2851_v35, 7 }
 0x69f   :  { %v936_v33 = vpop.f32.mrf.mxu1  ;;  %v1001_v36 = vrot.slane %v992_v23, 5  ;;  %v1003_v37 = vrot.slane %v992_v23, 6 }
 0x6a0   :  { %v941_v38 = vadd.f32 %v935_v31, %v2775_v47  ;;  %v937_v39 = vadd.f32 %v936_v33, %v880_v18  ;;  %v994_v22 = vpop.f32.mrf.mxu0 }
 0x6a1   :  { %v1009_v2 = vadd.f32 %v1001_v36, %v2666_v26  ;;  %v1011_v41 = vadd.f32 %v1003_v37, %v2670_v30  ;;  %v938_v42 = vpop.f32.mrf.mxu1  ;;  %v1002_v43 = vrot.slane %v994_v22, 5  ;;  %v1004_v44 = vrot.slane %v994_v22, 6 }
 0x6a2   :  { %2303 = vtanh.f32 %v941_v38  ;;  %v942_v45 = vadd.f32 %v937_v39, %v2779_v50  ;;  %v996_v48 = vpop.f32.mrf.mxu0 }
 0x6a3   :  { %2305 = vtanh.f32 %v1009_v2  ;;  %v1010_v49 = vadd.f32 %v1002_v43, %v2677_v40  ;;  %v939_v51 = vpop.f32.mrf.mxu1  ;;  %v1012_v10 = vadd.f32 %v1004_v44, %v2673_v34 }
 0x6a4   :  { %v997_v8 = vpop.f32.mrf.mxu0  ;;  %2307 = vtanh.f32 %v1011_v41 }
 0x6a5   :  { %2309 = vtanh.f32 %v942_v45 }
 0x6a6   :  { %2311 = vtanh.f32 %v1010_v49 }
 0x6a7   :  { %2313 = vtanh.f32 %v1012_v10 }
 0x6af   :  { %v2304_v13 = vpop.eup %2303 }
 0x6b0   :  { %v2306_v11 = vpop.eup %2305  ;;  %v945_v21 = vmul.f32 0.5, %v2304_v13 }
 0x6b1   :  { %v1017_v46 = vmul.f32 0.5, %v2306_v11  ;;  %v2308_v20 = vpop.eup %2307 }
 0x6b2   :  { %v946_v27 = vadd.f32 0.5, %v945_v21  ;;  %v2310_v17 = vpop.eup %2309  ;;  %v1018_v18 = vmul.f32 0.5, %v2308_v20 }
 0x6b3   :  { %v1019_v4 = vadd.f32 0.5, %v1017_v46  ;;  %v2312_v24 = vpop.eup %2311  ;;  %v947_v43 = vmul.f32 0.5, %v2310_v17 }
 0x6b4   :  { %v950_v28 = vmul.f32 %v2310_v17, %v946_v27  ;;  %v1020_v23 = vadd.f32 0.5, %v1018_v18  ;;  %v2314_v36 = vpop.eup %2313  ;;  %v949_v19 = vmul.f32 %v946_v27, %v2846_v32  ;;  %v1021_v45 = vmul.f32 0.5, %v2312_v24 }
 0x6b5   :  { %v1033_v31 = vmul.f32 %v2312_v24, %v1019_v4  ;;  %v1031_v33 = vmul.f32 %v1027_v25, %v1019_v4  ;;  %v948_v44 = vadd.f32 0.5, %v947_v43  ;;  %v1022_v48 = vmul.f32 0.5, %v2314_v36 }
 0x6b6   :  { %952 = vrot.lane.b32.xlu1 %v950_v28, %s2538_s3  ;;  %v1032_v37 = vmul.f32 %v1028_v29, %v1020_v23  ;;  %v1034_v38 = vmul.f32 %v2314_v36, %v1020_v23  ;;  %v1023_v49 = vadd.f32 0.5, %v1021_v45 }
 0x6b7   :  { %1037 = vrot.lane.b32.xlu0 %v1033_v31, %s2538_s3  ;;  %v1024_v11 = vadd.f32 0.5, %v1022_v48  ;;  %v2913_v31 = vld [vmem:[#allocation5 + $0x30] ss:$8 sps:$4 sm:$0xff]  }
 0x6ba   :  { %1039 = vrot.lane.b32.xlu1 %v1034_v38, %s2538_s3 }
 0x728   :  { %v953_v39 = vpop.permute.xlu1 %952 }
 0x729   :  { %v2900_v22 = vadd.f32 %v953_v39, %v949_v19  ;;  %v1038_v2 = vpop.permute.xlu0 %1037 }
 0x72a   :  { %v2902_v41 = vadd.f32 %v1038_v2, %v1031_v33 }
 0x72b   :  { %2315 = vtanh.f32 %v2900_v22 }
 0x72c   :  { %2317 = vtanh.f32 %v2902_v41  ;;  %v1040_v35 = vpop.permute.xlu1 %1039 }
 0x72d   :  { %v2906_v42 = vadd.f32 %v1040_v35, %v1032_v37 }
 0x72f   :  { %2319 = vtanh.f32 %v2906_v42 }
 0x738   :  { %v2316_v32 = vpop.eup %2315 }
 0x739   :  { %v2318_v51 = vpop.eup %2317  ;;  %v957_v8 = vmul.f32 %v2316_v32, %v948_v44  ;;  %v1239_v32 = vrot.slane %v2902_v41, 7 }
 0x73a   :  { %v1047_v10 = vmul.f32 %v2318_v51, %v1023_v49 }
 0x73b   :  { %v1049_v13 = vpack.c.bf16 %v957_v8, %v957_v8  ;;  %v1240_v8 = vrot.slane %v2906_v42, 7 }
 0x73c   :  { %v2320_v21 = vpop.eup %2319  ;;  %v1097_v46 = vpack.c.bf16 %v1047_v10, %v1047_v10 }
 0x73d   :  { %1051 = vrot.lane.b32.xlu0 %v1049_v13, %s2538_s3  ;;  %v1048_v20 = vmul.f32 %v2320_v21, %v1024_v11 }
 0x73e   :  { %v1101_v25 = vunpack.c.l.b16 %v1097_v46 }
 0x73f   :  { %v1098_v27 = vpack.c.bf16 %v1048_v20, %v1048_v20 }
 0x740   :  { %v1103_v18 = vrot.slane %v1101_v25, 3 }
 0x741   :  { %v1102_v4 = vunpack.c.l.b16 %v1098_v27 }
 0x743   :  { %v1104_v17 = vrot.slane %v1102_v4, 2 }
 0x745   :  { %v1105_v24 = vsel %vm431_vm2, %v1104_v17, %v1103_v18 }
 0x746   :  { %v1106_v28 = vpack.c.b16 %v1105_v24, %v1105_v24 }
 0x748   :  { %1107 = vrot.lane.b32.xlu1 %v1106_v28, %s2538_s3 }
 0x7af   :  { %v1052_v29 = vpop.permute.xlu0 %1051 }
 0x7b0   :  { %2161 = vmatmul.mubr.msk.bf16.vlgmr.msra.gmra.mxu1 %vm240_vm3, %v1052_v29 }
 0x7b1   :  { %1179 = vmatpush1.bf16.msra.mxu1 %v2913_v31  ;;  %1202 = vmatprep.mubr.bf16.mxu1 %v2537_v0 }
 0x7b2   :  { %1180 = vmatprep.subr.bf16.mxu1 %v2633_v7  ;;  %v2939_v7 = vld [vmem:[#allocation5 + $0x34] ss:$8 sps:$4 sm:$0xff]  }
 0x7b5   :  { %1181 = vmatpush1.bf16.msra.mxu1 %v2638_v9 }
 0x7b6   :  { %1182 = vmatprep.subr.bf16.mxu1 %v2641_v12 }
 0x7b9   :  { %1183 = vmatpush1.bf16.msra.mxu1 %v2644_v14 }
 0x7ba   :  { %v1108_v23 = vpop.permute.xlu1 %1107  ;;  %1184 = vmatprep.subr.bf16.mxu1 %v2646_v15 }
 0x7bb   :  { %2162 = vmatmul.mubr.msk.bf16.vlgmr.msra.gmra.mxu0 %vm240_vm3, %v1108_v23 }
 0x7bc   :  { %1277 = vmatpush1.bf16.msra.mxu0 %v2684_v53  ;;  %1300 = vmatprep.mubr.bf16.mxu0 %v2537_v0 }
 0x7bd   :  { %1185 = vmatpush1.bf16.msra.mxu1 %v2649_v16  ;;  %1278 = vmatprep.subr.bf16.mxu0 %v2686_v54 }
 0x7be   :  { %1332 = vmatprep.subr.bf16.mxu1 %v2689_v55 }
 0x7c0   :  { %2163 = vmatmul.mubr.msk.bf16.vlgmr.msra.gmra.mxu1 %vm240_vm3, %v1108_v23  ;;  %1279 = vmatpush1.bf16.msra.mxu0 %v2692_v56 }
 0x7c1   :  { %1280 = vmatprep.subr.bf16.mxu0 %v2699_v59  ;;  %1333 = vmatpush1.bf16.msra.mxu1 %v2694_v57 }
 0x7c2   :  { %1334 = vmatprep.subr.bf16.mxu1 %v2696_v58  ;;  %1356 = vmatprep.mubr.bf16.mxu1 %v2537_v0 }
 0x7c4   :  { %1281 = vmatpush1.bf16.msra.mxu0 %v2709_v62 }
 0x7c5   :  { %1282 = vmatprep.subr.bf16.mxu0 %v2712_v63  ;;  %1335 = vmatpush1.bf16.msra.mxu1 %v2703_v60 }
 0x7c6   :  { %1336 = vmatprep.subr.bf16.mxu1 %v2706_v61 }
 0x7c8   :  { %1283 = vmatpush1.bf16.msra.mxu0 %v2721_v5 }
 0x7c9   :  { %1390 = vmatprep.subr.bf16.mxu0 %v2939_v7  ;;  %1337 = vmatpush1.bf16.msra.mxu1 %v2715_v1 }
 0x7ca   :  { %1338 = vmatprep.subr.bf16.mxu1 %v2718_v3 }
 0x7cd   :  { %1339 = vmatpush1.bf16.msra.mxu1 %v2725_v6 }
 0x7ce   :  { %1488 = vmatprep.subr.bf16.mxu1 %v2682_v52 }
 0x870   :  { %v1090_v9 = vpop.f32.mrf.mxu1 }
 0x872   :  { %v1092_v12 = vpop.f32.mrf.mxu1 }
 0x874   :  { %v1094_v14 = vpop.f32.mrf.mxu1 }
 0x876   :  { %v1095_v15 = vpop.f32.mrf.mxu1 }
 0x87b   :  { %v1146_v16 = vpop.f32.mrf.mxu0 }
 0x87c   :  { %v1147_v53 = vadd.f32 %v1146_v16, %v1090_v9 }
 0x87d   :  { %v1148_v54 = vpop.f32.mrf.mxu0 }
 0x87e   :  { %v1153_v55 = vadd.f32 %v1147_v53, %v2775_v47  ;;  %v1149_v56 = vadd.f32 %v1148_v54, %v1092_v12 }
 0x87f   :  { %v1150_v57 = vpop.f32.mrf.mxu0 }
 0x880   :  { %2321 = vtanh.f32 %v1153_v55  ;;  %v1154_v58 = vadd.f32 %v1149_v56, %v2779_v50  ;;  %v1204_v59 = vpop.f32.mrf.mxu1 }
 0x881   :  { %v1213_v60 = vrot.slane %v1204_v59, 4  ;;  %v1215_v61 = vrot.slane %v1204_v59, 5  ;;  %v1151_v62 = vpop.f32.mrf.mxu0 }
 0x882   :  { %v1206_v63 = vpop.f32.mrf.mxu1  ;;  %2323 = vtanh.f32 %v1154_v58 }
 0x883   :  { %v1221_v52 = vadd.f32 %v1213_v60, %v2666_v26  ;;  %v1223_v1 = vadd.f32 %v1215_v61, %v2670_v30  ;;  %v1214_v3 = vrot.slane %v1206_v63, 4  ;;  %v1216_v5 = vrot.slane %v1206_v63, 5 }
 0x884   :  { %v1208_v6 = vpop.f32.mrf.mxu1 }
 0x885   :  { %2325 = vtanh.f32 %v1221_v52  ;;  %v1222_v33 = vadd.f32 %v1214_v3, %v2677_v40  ;;  %v1224_v36 = vadd.f32 %v1216_v5, %v2673_v34  ;;  %v2976_v3 = vld [vmem:[#allocation5 + $0x20] ss:$8 sps:$4 sm:$0xff]   ;;  %v2979_v5 = vld [vmem:[#allocation5 + $0x14] ss:$8 sps:$4 sm:$0xff]   ;;  %v2982_v6 = vld [vmem:[#allocation5 + $0x10] ss:$8 sps:$4 sm:$0xff]  }
 0x886   :  { %2327 = vtanh.f32 %v1223_v1  ;;  %v1209_v37 = vpop.f32.mrf.mxu1  ;;  %v2973_v1 = vld [vmem:[#allocation5 + $0x24] ss:$8 sps:$4 sm:$0xff]  }
 0x887   :  { %2329 = vtanh.f32 %v1222_v33  ;;  %v2985_v33 = vld [vmem:[#allocation5 + $0x4] ss:$8 sps:$4 sm:$0xff]   ;;  %v2989_v37 = vld [vmem:[#allocation5] ss:$8 sps:$4 sm:$0xff]  }
 0x888   :  { %2331 = vtanh.f32 %v1224_v36 }
 0x88d   :  { %v2322_v38 = vpop.eup %2321 }
 0x88e   :  { %v1157_v19 = vmul.f32 0.5, %v2322_v38  ;;  %v2992_v38 = vld [vmem:[#allocation8 + $0x30] ss:$8 sps:$4 sm:$0xff]  }
 0x88f   :  { %v2324_v2 = vpop.eup %2323 }
 0x890   :  { %v1158_v39 = vadd.f32 0.5, %v1157_v19  ;;  %v1159_v24 = vmul.f32 0.5, %v2324_v2  ;;  %v2995_v19 = vld [vmem:[#allocation7 + $0x34] ss:$8 sps:$4 sm:$0xff]  }
 0x892   :  { %v2326_v35 = vpop.eup %2325  ;;  %v1162_v43 = vmul.f32 %v2324_v2, %v1158_v39  ;;  %v1161_v27 = vmul.f32 %v1158_v39, %v2900_v22  ;;  %v1160_v28 = vadd.f32 0.5, %v1159_v24  ;;  %v2998_v39 = vld [vmem:[#allocation8 + $0x24] ss:$8 sps:$4 sm:$0xff]   ;;  %v3003_v2 = vld [vmem:[#allocation7 + $0x30] ss:$8 sps:$4 sm:$0xff]  }
 0x893   :  { %v2328_v45 = vpop.eup %2327  ;;  %v1229_v44 = vmul.f32 0.5, %v2326_v35  ;;  %v3007_v35 = vld [vmem:[#allocation8 + $0x20] ss:$8 sps:$4 sm:$0xff]  }
 0x894   :  { %1164 = vrot.lane.b32.xlu0 %v1162_v43, %s2538_s3  ;;  %v1230_v48 = vmul.f32 0.5, %v2328_v45  ;;  %v2330_v51 = vpop.eup %2329  ;;  %v3010_v43 = vld [vmem:[#allocation7 + $0x24] ss:$8 sps:$4 sm:$0xff]   ;;  %v3013_v45 = vld [vmem:[#allocation8 + $0x14] ss:$8 sps:$4 sm:$0xff]  }
 0x895   :  { %v1231_v49 = vadd.f32 0.5, %v1229_v44  ;;  %v2332_v13 = vpop.eup %2331  ;;  %v1233_v23 = vmul.f32 0.5, %v2330_v51  ;;  %v3016_v44 = vld [vmem:[#allocation7 + $0x20] ss:$8 sps:$4 sm:$0xff]  }
 0x896   :  { %v1232_v10 = vadd.f32 0.5, %v1230_v48  ;;  %v1234_v9 = vmul.f32 0.5, %v2332_v13  ;;  %v3019_v48 = vld [vmem:[#allocation8 + $0x10] ss:$8 sps:$4 sm:$0xff]  }
 0x897   :  { %v1245_v11 = vmul.f32 %v2330_v51, %v1231_v49  ;;  %v1243_v21 = vmul.f32 %v1239_v32, %v1231_v49  ;;  %v1235_v14 = vadd.f32 0.5, %v1233_v23  ;;  %v3022_v32 = vld [vmem:[#allocation7 + $0x14] ss:$8 sps:$4 sm:$0xff]   ;;  %v3025_v49 = vld [vmem:[#allocation8 + $0x4] ss:$8 sps:$4 sm:$0xff]  }
 0x898   :  { %v1246_v46 = vmul.f32 %v2332_v13, %v1232_v10  ;;  %v1244_v20 = vmul.f32 %v1240_v8, %v1232_v10  ;;  %v1236_v16 = vadd.f32 0.5, %v1234_v9  ;;  %v3028_v51 = vld [vmem:[#allocation7 + $0x10] ss:$8 sps:$4 sm:$0xff]   ;;  %v3031_v8 = vld [vmem:[#allocation8] ss:$8 sps:$4 sm:$0xff]  }
 0x899   :  { %1249 = vrot.lane.b32.xlu1 %v1245_v11, %s2538_s3  ;;  %v3034_v10 = vld [vmem:[#allocation7 + $0x4] ss:$8 sps:$4 sm:$0xff]   ;;  %v3038_v13 = vld [vmem:[#allocation7] ss:$8 sps:$4 sm:$0xff]   ;;  %v3041_v11 = vld [vmem:[#allocation8 + $0x34] ss:$8 sps:$4 sm:$0xff]  }
 0x89a   :  { %1251 = vrot.lane.b32.xlu0 %v1246_v46, %s2538_s3 }
 0x906   :  { %v1165_v25 = vpop.permute.xlu0 %1164 }
 0x907   :  { %v2958_v4 = vadd.f32 %v1165_v25, %v1161_v27 }
 0x909   :  { %2333 = vtanh.f32 %v2958_v4 }
 0x90b   :  { %v1250_v41 = vpop.permute.xlu1 %1249 }
 0x90c   :  { %v1252_v18 = vpop.permute.xlu0 %1251  ;;  %v2961_v42 = vadd.f32 %v1250_v41, %v1243_v21 }
 0x90d   :  { %v2963_v17 = vadd.f32 %v1252_v18, %v1244_v20 }
 0x90e   :  { %2335 = vtanh.f32 %v2961_v42 }
 0x90f   :  { %2337 = vtanh.f32 %v2963_v17 }
 0x916   :  { %v2334_v29 = vpop.eup %2333 }
 0x917   :  { %v1169_v22 = vmul.f32 %v2334_v29, %v1160_v28 }
 0x919   :  { %v1261_v12 = vpack.c.bf16 %v1169_v22, %v1169_v22 }
 0x91b   :  { %v2336_v15 = vpop.eup %2335  ;;  %1263 = vrot.lane.b32.xlu1 %v1261_v12, %s2538_s3 }
 0x91c   :  { %v2338_v53 = vpop.eup %2337  ;;  %v1259_v54 = vmul.f32 %v2336_v15, %v1235_v14 }
 0x91d   :  { %v1260_v55 = vmul.f32 %v2338_v53, %v1236_v16 }
 0x91e   :  { %v1309_v56 = vpack.c.bf16 %v1259_v54, %v1259_v54 }
 0x91f   :  { %v1310_v57 = vpack.c.bf16 %v1260_v55, %v1260_v55 }
 0x920   :  { %v1313_v58 = vunpack.c.l.b16 %v1309_v56 }
 0x921   :  { %v1314_v59 = vunpack.c.l.b16 %v1310_v57 }
 0x922   :  { %v1315_v60 = vrot.slane %v1313_v58, 4 }
 0x923   :  { %v1316_v61 = vrot.slane %v1314_v59, 3 }
 0x925   :  { %v1317_v62 = vsel %vm431_vm2, %v1316_v61, %v1315_v60 }
 0x926   :  { %v1318_v63 = vpack.c.b16 %v1317_v62, %v1317_v62 }
 0x928   :  { %1319 = vrot.lane.b32.xlu0 %v1318_v63, %s2538_s3 }
 0x98d   :  { %v1264_v52 = vpop.permute.xlu1 %1263 }
 0x98e   :  { %2164 = vmatmul.mubr.msk.bf16.vlgmr.msra.gmra.mxu0 %vm240_vm3, %v1264_v52 }
 0x98f   :  { %1391 = vmatpush1.bf16.msra.mxu0 %v2913_v31  ;;  %1414 = vmatprep.mubr.bf16.mxu0 %v2537_v0 }
 0x990   :  { %1392 = vmatprep.subr.bf16.mxu0 %v2973_v1 }
 0x993   :  { %1393 = vmatpush1.bf16.msra.mxu0 %v2976_v3 }
 0x994   :  { %1394 = vmatprep.subr.bf16.mxu0 %v2979_v5 }
 0x997   :  { %1395 = vmatpush1.bf16.msra.mxu0 %v2982_v6 }
 0x998   :  { %1396 = vmatprep.subr.bf16.mxu0 %v2985_v33 }
 0x99a   :  { %v1320_v36 = vpop.permute.xlu0 %1319 }
 0x99b   :  { %2165 = vmatmul.mubr.msk.bf16.vlgmr.msra.gmra.mxu1 %vm240_vm3, %v1320_v36  ;;  %1397 = vmatpush1.bf16.msra.mxu0 %v2989_v37 }
 0x99c   :  { %1489 = vmatpush1.bf16.msra.mxu1 %v2992_v38  ;;  %1544 = vmatprep.subr.bf16.mxu0 %v2995_v19 }
 0x99d   :  { %1490 = vmatprep.subr.bf16.mxu1 %v2998_v39  ;;  %1512 = vmatprep.mubr.bf16.mxu1 %v2537_v0 }
 0x99e   :  { %2166 = vmatmul.mubr.msk.bf16.vlgmr.msra.gmra.mxu0 %vm240_vm3, %v1320_v36 }
 0x99f   :  { %1545 = vmatpush1.bf16.msra.mxu0 %v3003_v2  ;;  %1568 = vmatprep.mubr.bf16.mxu0 %v2537_v0 }
 0x9a0   :  { %1491 = vmatpush1.bf16.msra.mxu1 %v3007_v35  ;;  %1546 = vmatprep.subr.bf16.mxu0 %v3010_v43 }
 0x9a1   :  { %1492 = vmatprep.subr.bf16.mxu1 %v3013_v45 }
 0x9a3   :  { %1547 = vmatpush1.bf16.msra.mxu0 %v3016_v44 }
 0x9a4   :  { %1493 = vmatpush1.bf16.msra.mxu1 %v3019_v48  ;;  %1548 = vmatprep.subr.bf16.mxu0 %v3022_v32 }
 0x9a5   :  { %1494 = vmatprep.subr.bf16.mxu1 %v3025_v49 }
 0x9a7   :  { %1549 = vmatpush1.bf16.msra.mxu0 %v3028_v51 }
 0x9a8   :  { %1495 = vmatpush1.bf16.msra.mxu1 %v3031_v8  ;;  %1550 = vmatprep.subr.bf16.mxu0 %v3034_v10 }
 0x9a9   :  { %1602 = vmatprep.subr.bf16.mxu1 %v2939_v7 }
 0x9ab   :  { %1551 = vmatpush1.bf16.msra.mxu0 %v3038_v13 }
 0x9ac   :  { %1700 = vmatprep.subr.bf16.mxu0 %v3041_v11 }
 0xa4e   :  { %v1302_v21 = vpop.f32.mrf.mxu0 }
 0xa50   :  { %v1304_v46 = vpop.f32.mrf.mxu0 }
 0xa52   :  { %v1306_v20 = vpop.f32.mrf.mxu0 }
 0xa54   :  { %v1307_v27 = vpop.f32.mrf.mxu0 }
 0xa55   :  { %v1451_v27 = vrot.slane %v2961_v42, 7 }
 0xa5b   :  { %v1358_v25 = vpop.f32.mrf.mxu1 }
 0xa5c   :  { %v1359_v41 = vadd.f32 %v1358_v25, %v1302_v21 }
 0xa5d   :  { %v1360_v18 = vpop.f32.mrf.mxu1 }
 0xa5e   :  { %v1365_v24 = vadd.f32 %v1359_v41, %v2775_v47  ;;  %v1361_v28 = vadd.f32 %v1360_v18, %v1304_v46  ;;  %v1416_v29 = vpop.f32.mrf.mxu0  ;;  %v1452_v18 = vrot.slane %v2963_v17, 7 }
 0xa5f   :  { %v1362_v23 = vpop.f32.mrf.mxu1  ;;  %v1425_v22 = vrot.slane %v1416_v29, 3  ;;  %v1427_v9 = vrot.slane %v1416_v29, 4 }
 0xa60   :  { %2339 = vtanh.f32 %v1365_v24  ;;  %v1366_v12 = vadd.f32 %v1361_v28, %v2779_v50  ;;  %v1418_v14 = vpop.f32.mrf.mxu0 }
 0xa61   :  { %v1433_v15 = vadd.f32 %v1425_v22, %v2666_v26  ;;  %v1435_v16 = vadd.f32 %v1427_v9, %v2670_v30  ;;  %v1363_v53 = vpop.f32.mrf.mxu1  ;;  %v1426_v54 = vrot.slane %v1418_v14, 3  ;;  %v1428_v55 = vrot.slane %v1418_v14, 4 }
 0xa62   :  { %2341 = vtanh.f32 %v1366_v12  ;;  %v1420_v56 = vpop.f32.mrf.mxu0 }
 0xa63   :  { %2343 = vtanh.f32 %v1433_v15  ;;  %v1434_v57 = vadd.f32 %v1426_v54, %v2677_v40  ;;  %v1436_v58 = vadd.f32 %v1428_v55, %v2673_v34 }
 0xa64   :  { %2345 = vtanh.f32 %v1435_v16  ;;  %v1421_v59 = vpop.f32.mrf.mxu0 }
 0xa65   :  { %2347 = vtanh.f32 %v1434_v57 }
 0xa66   :  { %2349 = vtanh.f32 %v1436_v58 }
 0xa6d   :  { %v2340_v60 = vpop.eup %2339 }
 0xa6e   :  { %v1369_v61 = vmul.f32 0.5, %v2340_v60 }
 0xa6f   :  { %v2342_v62 = vpop.eup %2341 }
 0xa70   :  { %v2344_v63 = vpop.eup %2343  ;;  %v1370_v52 = vadd.f32 0.5, %v1369_v61  ;;  %v1371_v54 = vmul.f32 0.5, %v2342_v62 }
 0xa71   :  { %v2346_v36 = vpop.eup %2345  ;;  %v1441_v21 = vmul.f32 0.5, %v2344_v63 }
 0xa72   :  { %v1374_v46 = vmul.f32 %v2342_v62, %v1370_v52  ;;  %v1442_v20 = vmul.f32 0.5, %v2346_v36  ;;  %v2348_v41 = vpop.eup %2347  ;;  %v1373_v12 = vmul.f32 %v1370_v52, %v2958_v4  ;;  %v1372_v56 = vadd.f32 0.5, %v1371_v54 }
 0xa73   :  { %v1443_v25 = vadd.f32 0.5, %v1441_v21  ;;  %v2350_v28 = vpop.eup %2349  ;;  %v1445_v55 = vmul.f32 0.5, %v2348_v41 }
 0xa74   :  { %1376 = vrot.lane.b32.xlu1 %v1374_v46, %s2538_s3  ;;  %v1444_v24 = vadd.f32 0.5, %v1442_v20  ;;  %v1446_v57 = vmul.f32 0.5, %v2350_v28 }
 0xa75   :  { %v1457_v29 = vmul.f32 %v2348_v41, %v1443_v25  ;;  %v1455_v23 = vmul.f32 %v1451_v27, %v1443_v25  ;;  %v1447_v59 = vadd.f32 0.5, %v1445_v55 }
 0xa76   :  { %v1458_v22 = vmul.f32 %v2350_v28, %v1444_v24  ;;  %v1456_v9 = vmul.f32 %v1452_v18, %v1444_v24  ;;  %v1448_v63 = vadd.f32 0.5, %v1446_v57 }
 0xa77   :  { %1461 = vrot.lane.b32.xlu0 %v1457_v29, %s2538_s3 }
 0xa78   :  { %1463 = vrot.lane.b32.xlu1 %v1458_v22, %s2538_s3 }
 0xae6   :  { %v1377_v14 = vpop.permute.xlu1 %1376 }
 0xae7   :  { %v3056_v42 = vadd.f32 %v1377_v14, %v1373_v12 }
 0xae9   :  { %2351 = vtanh.f32 %v3056_v42  ;;  %v1462_v17 = vpop.permute.xlu0 %1461 }
 0xaea   :  { %v3059_v15 = vadd.f32 %v1462_v17, %v1455_v23  ;;  %v1464_v16 = vpop.permute.xlu1 %1463 }
 0xaeb   :  { %v3061_v53 = vadd.f32 %v1464_v16, %v1456_v9 }
 0xaec   :  { %2353 = vtanh.f32 %v3059_v15 }
 0xaed   :  { %2355 = vtanh.f32 %v3061_v53 }
 0xaf6   :  { %v2352_v4 = vpop.eup %2351 }
 0xaf7   :  { %v1381_v58 = vmul.f32 %v2352_v4, %v1372_v56 }
 0xaf9   :  { %v2354_v60 = vpop.eup %2353  ;;  %v1473_v61 = vpack.c.bf16 %v1381_v58, %v1381_v58 }
 0xafa   :  { %v2356_v52 = vpop.eup %2355  ;;  %v1471_v36 = vmul.f32 %v2354_v60, %v1447_v59 }
 0xafb   :  { %1475 = vrot.lane.b32.xlu0 %v1473_v61, %s2538_s3  ;;  %v1472_v21 = vmul.f32 %v2356_v52, %v1448_v63 }
 0xafc   :  { %v1521_v46 = vpack.c.bf16 %v1471_v36, %v1471_v36 }
 0xafd   :  { %v1522_v20 = vpack.c.bf16 %v1472_v21, %v1472_v21 }
 0xafe   :  { %v1525_v27 = vunpack.c.l.b16 %v1521_v46 }
 0xaff   :  { %v1526_v25 = vunpack.c.l.b16 %v1522_v20 }
 0xb00   :  { %v1527_v18 = vrot.slane %v1525_v27, 5 }
 0xb01   :  { %v1528_v62 = vrot.slane %v1526_v25, 4 }
 0xb03   :  { %v1529_v41 = vsel %vm431_vm2, %v1528_v62, %v1527_v18 }
 0xb04   :  { %v1530_v24 = vpack.c.b16 %v1529_v41, %v1529_v41 }
 0xb06   :  { %1531 = vrot.lane.b32.xlu1 %v1530_v24, %s2538_s3 }
 0xb6d   :  { %v1476_v28 = vpop.permute.xlu0 %1475 }
 0xb6e   :  { %2167 = vmatmul.mubr.msk.bf16.vlgmr.msra.gmra.mxu1 %vm240_vm3, %v1476_v28 }
 0xb6f   :  { %1603 = vmatpush1.bf16.msra.mxu1 %v2913_v31  ;;  %1626 = vmatprep.mubr.bf16.mxu1 %v2537_v0 }
 0xb70   :  { %1604 = vmatprep.subr.bf16.mxu1 %v2973_v1 }
 0xb73   :  { %1605 = vmatpush1.bf16.msra.mxu1 %v2976_v3 }
 0xb74   :  { %1606 = vmatprep.subr.bf16.mxu1 %v2979_v5 }
 0xb77   :  { %1607 = vmatpush1.bf16.msra.mxu1 %v2982_v6 }
 0xb78   :  { %v1532_v29 = vpop.permute.xlu1 %1531  ;;  %1608 = vmatprep.subr.bf16.mxu1 %v2985_v33 }
 0xb79   :  { %2168 = vmatmul.mubr.msk.bf16.vlgmr.msra.gmra.mxu0 %vm240_vm3, %v1532_v29 }
 0xb7a   :  { %1701 = vmatpush1.bf16.msra.mxu0 %v2992_v38  ;;  %1724 = vmatprep.mubr.bf16.mxu0 %v2537_v0 }
 0xb7b   :  { %1609 = vmatpush1.bf16.msra.mxu1 %v2989_v37  ;;  %1702 = vmatprep.subr.bf16.mxu0 %v2998_v39 }
 0xb7c   :  { %1756 = vmatprep.subr.bf16.mxu1 %v2995_v19 }
 0xb7e   :  { %2169 = vmatmul.mubr.msk.bf16.vlgmr.msra.gmra.mxu1 %vm240_vm3, %v1532_v29  ;;  %1703 = vmatpush1.bf16.msra.mxu0 %v3007_v35 }
 0xb7f   :  { %1704 = vmatprep.subr.bf16.mxu0 %v3013_v45  ;;  %1757 = vmatpush1.bf16.msra.mxu1 %v3003_v2 }
 0xb80   :  { %1758 = vmatprep.subr.bf16.mxu1 %v3010_v43  ;;  %1780 = vmatprep.mubr.bf16.mxu1 %v2537_v0 }
 0xb82   :  { %1705 = vmatpush1.bf16.msra.mxu0 %v3019_v48 }
 0xb83   :  { %1706 = vmatprep.subr.bf16.mxu0 %v3025_v49  ;;  %1759 = vmatpush1.bf16.msra.mxu1 %v3016_v44 }
 0xb84   :  { %1760 = vmatprep.subr.bf16.mxu1 %v3022_v32 }
 0xb86   :  { %1707 = vmatpush1.bf16.msra.mxu0 %v3031_v8 }
 0xb87   :  { %1814 = vmatprep.subr.bf16.mxu0 %v2939_v7  ;;  %1761 = vmatpush1.bf16.msra.mxu1 %v3028_v51 }
 0xb88   :  { %1762 = vmatprep.subr.bf16.mxu1 %v3034_v10 }
 0xb8b   :  { %1763 = vmatpush1.bf16.msra.mxu1 %v3038_v13 }
 0xb8c   :  { %1912 = vmatprep.subr.bf16.mxu1 %v3041_v11 }
 0xc2e   :  { %v1514_v23 = vpop.f32.mrf.mxu1 }
 0xc30   :  { %v1516_v22 = vpop.f32.mrf.mxu1 }
 0xc32   :  { %v1518_v9 = vpop.f32.mrf.mxu1 }
 0xc34   :  { %v1519_v12 = vpop.f32.mrf.mxu1 }
 0xc39   :  { %v1570_v14 = vpop.f32.mrf.mxu0 }
 0xc3a   :  { %v1571_v17 = vadd.f32 %v1570_v14, %v1514_v23  ;;  %v1664_v14 = vrot.slane %v3061_v53, 7 }
 0xc3b   :  { %v1572_v16 = vpop.f32.mrf.mxu0 }
 0xc3c   :  { %v1577_v54 = vadd.f32 %v1571_v17, %v2775_v47  ;;  %v1573_v55 = vadd.f32 %v1572_v16, %v1516_v22  ;;  %v1663_v22 = vrot.slane %v3059_v15, 7 }
 0xc3d   :  { %v1574_v56 = vpop.f32.mrf.mxu0 }
 0xc3e   :  { %2357 = vtanh.f32 %v1577_v54  ;;  %v1578_v7 = vadd.f32 %v1573_v55, %v2779_v50  ;;  %v1628_v57 = vpop.f32.mrf.mxu1 }
 0xc3f   :  { %v1637_v4 = vrot.slane %v1628_v57, 2  ;;  %v1639_v58 = vrot.slane %v1628_v57, 3  ;;  %v1575_v59 = vpop.f32.mrf.mxu0 }
 0xc40   :  { %v1630_v60 = vpop.f32.mrf.mxu1  ;;  %2359 = vtanh.f32 %v1578_v7 }
 0xc41   :  { %v1645_v11 = vadd.f32 %v1637_v4, %v2666_v26  ;;  %v1647_v61 = vadd.f32 %v1639_v58, %v2670_v30  ;;  %v1638_v63 = vrot.slane %v1630_v60, 2  ;;  %v1640_v52 = vrot.slane %v1630_v60, 3 }
 0xc42   :  { %v1632_v36 = vpop.f32.mrf.mxu1 }
 0xc43   :  { %2361 = vtanh.f32 %v1645_v11  ;;  %v1646_v21 = vadd.f32 %v1638_v63, %v2677_v40  ;;  %v1648_v46 = vadd.f32 %v1640_v52, %v2673_v34 }
 0xc44   :  { %2363 = vtanh.f32 %v1647_v61  ;;  %v1633_v20 = vpop.f32.mrf.mxu1 }
 0xc45   :  { %2365 = vtanh.f32 %v1646_v21 }
 0xc46   :  { %2367 = vtanh.f32 %v1648_v46 }
 0xc4b   :  { %v2358_v27 = vpop.eup %2357 }
 0xc4c   :  { %v1581_v25 = vmul.f32 0.5, %v2358_v27 }
 0xc4d   :  { %v2360_v62 = vpop.eup %2359 }
 0xc4e   :  { %v1582_v18 = vadd.f32 0.5, %v1581_v25  ;;  %v1583_v11 = vmul.f32 0.5, %v2360_v62 }
 0xc50   :  { %v2362_v41 = vpop.eup %2361  ;;  %v1586_v24 = vmul.f32 %v2360_v62, %v1582_v18  ;;  %v1585_v57 = vmul.f32 %v1582_v18, %v3056_v42  ;;  %v1584_v61 = vadd.f32 0.5, %v1583_v11 }
 0xc51   :  { %v2364_v28 = vpop.eup %2363  ;;  %v1653_v29 = vmul.f32 0.5, %v2362_v41 }
 0xc52   :  { %1588 = vrot.lane.b32.xlu0 %v1586_v24, %s2538_s3  ;;  %v1654_v23 = vmul.f32 0.5, %v2364_v28  ;;  %v2366_v12 = vpop.eup %2365 }
 0xc53   :  { %v1655_v9 = vadd.f32 0.5, %v1653_v29  ;;  %v2368_v16 = vpop.eup %2367  ;;  %v1657_v52 = vmul.f32 0.5, %v2366_v12 }
 0xc54   :  { %v1656_v17 = vadd.f32 0.5, %v1654_v23  ;;  %v1658_v36 = vmul.f32 0.5, %v2368_v16 }
 0xc55   :  { %v1669_v54 = vmul.f32 %v2366_v12, %v1655_v9  ;;  %v1667_v55 = vmul.f32 %v1663_v22, %v1655_v9  ;;  %v1659_v46 = vadd.f32 0.5, %v1657_v52 }
 0xc56   :  { %v1670_v56 = vmul.f32 %v2368_v16, %v1656_v17  ;;  %v1668_v7 = vmul.f32 %v1664_v14, %v1656_v17  ;;  %v1660_v27 = vadd.f32 0.5, %v1658_v36 }
 0xc57   :  { %1673 = vrot.lane.b32.xlu1 %v1669_v54, %s2538_s3 }
 0xc58   :  { %1675 = vrot.lane.b32.xlu0 %v1670_v56, %s2538_s3 }
 0xcc4   :  { %v1589_v4 = vpop.permute.xlu0 %1588 }
 0xcc5   :  { %v3110_v58 = vadd.f32 %v1589_v4, %v1585_v57 }
 0xcc7   :  { %2369 = vtanh.f32 %v3110_v58 }
 0xcc9   :  { %v1674_v15 = vpop.permute.xlu1 %1673 }
 0xcca   :  { %v1676_v59 = vpop.permute.xlu0 %1675  ;;  %v3113_v53 = vadd.f32 %v1674_v15, %v1667_v55 }
 0xccb   :  { %v3115_v60 = vadd.f32 %v1676_v59, %v1668_v7 }
 0xccc   :  { %2371 = vtanh.f32 %v3113_v53  ;;  %v1875_v57 = vrot.slane %v3113_v53, 7 }
 0xccd   :  { %2373 = vtanh.f32 %v3115_v60 }
 0xcd4   :  { %v2370_v63 = vpop.eup %2369 }
 0xcd5   :  { %v1593_v42 = vmul.f32 %v2370_v63, %v1584_v61 }
 0xcd7   :  { %v1685_v21 = vpack.c.bf16 %v1593_v42, %v1593_v42 }
 0xcd9   :  { %v2372_v20 = vpop.eup %2371  ;;  %1687 = vrot.lane.b32.xlu1 %v1685_v21, %s2538_s3 }
 0xcda   :  { %v2374_v25 = vpop.eup %2373  ;;  %v1683_v18 = vmul.f32 %v2372_v20, %v1659_v46 }
 0xcdb   :  { %v1684_v41 = vmul.f32 %v2374_v25, %v1660_v27 }
 0xcdc   :  { %v1733_v24 = vpack.c.bf16 %v1683_v18, %v1683_v18 }
 0xcdd   :  { %v1734_v28 = vpack.c.bf16 %v1684_v41, %v1684_v41 }
 0xcde   :  { %v1737_v29 = vunpack.c.l.b16 %v1733_v24 }
 0xcdf   :  { %v1738_v23 = vunpack.c.l.b16 %v1734_v28 }
 0xce0   :  { %v1739_v22 = vrot.slane %v1737_v29, 6 }
 0xce1   :  { %v1740_v62 = vrot.slane %v1738_v23, 5 }
 0xce3   :  { %v1741_v9 = vsel %vm431_vm2, %v1740_v62, %v1739_v22 }
 0xce4   :  { %v1742_v12 = vpack.c.b16 %v1741_v9, %v1741_v9 }
 0xce6   :  { %1743 = vrot.lane.b32.xlu0 %v1742_v12, %s2538_s3 }
 0xd4b   :  { %v1688_v14 = vpop.permute.xlu1 %1687 }
 0xd4c   :  { %2170 = vmatmul.mubr.msk.bf16.vlgmr.msra.gmra.mxu0 %vm240_vm3, %v1688_v14 }
 0xd4d   :  { %1815 = vmatpush1.bf16.msra.mxu0 %v2913_v31  ;;  %1838 = vmatprep.mubr.bf16.mxu0 %v2537_v0 }
 0xd4e   :  { %1816 = vmatprep.subr.bf16.mxu0 %v2973_v1 }
 0xd51   :  { %1817 = vmatpush1.bf16.msra.mxu0 %v2976_v3 }
 0xd52   :  { %1818 = vmatprep.subr.bf16.mxu0 %v2979_v5 }
 0xd55   :  { %1819 = vmatpush1.bf16.msra.mxu0 %v2982_v6 }
 0xd56   :  { %1820 = vmatprep.subr.bf16.mxu0 %v2985_v33 }
 0xd58   :  { %v1744_v17 = vpop.permute.xlu0 %1743 }
 0xd59   :  { %2171 = vmatmul.mubr.msk.bf16.vlgmr.msra.gmra.mxu1 %vm240_vm3, %v1744_v17  ;;  %1821 = vmatpush1.bf16.msra.mxu0 %v2989_v37 }
 0xd5a   :  { %1913 = vmatpush1.bf16.msra.mxu1 %v2992_v38  ;;  %1968 = vmatprep.subr.bf16.mxu0 %v2995_v19 }
 0xd5b   :  { %1914 = vmatprep.subr.bf16.mxu1 %v2998_v39  ;;  %1936 = vmatprep.mubr.bf16.mxu1 %v2537_v0 }
 0xd5c   :  { %2172 = vmatmul.mubr.msk.bf16.vlgmr.msra.gmra.mxu0 %vm240_vm3, %v1744_v17 }
 0xd5d   :  { %1969 = vmatpush1.bf16.msra.mxu0 %v3003_v2  ;;  %1992 = vmatprep.mubr.bf16.mxu0 %v2537_v0 }
 0xd5e   :  { %1915 = vmatpush1.bf16.msra.mxu1 %v3007_v35  ;;  %1970 = vmatprep.subr.bf16.mxu0 %v3010_v43 }
 0xd5f   :  { %1916 = vmatprep.subr.bf16.mxu1 %v3013_v45 }
 0xd61   :  { %1971 = vmatpush1.bf16.msra.mxu0 %v3016_v44 }
 0xd62   :  { %1917 = vmatpush1.bf16.msra.mxu1 %v3019_v48  ;;  %1972 = vmatprep.subr.bf16.mxu0 %v3022_v32 }
 0xd63   :  { %1918 = vmatprep.subr.bf16.mxu1 %v3025_v49 }
 0xd65   :  { %1973 = vmatpush1.bf16.msra.mxu0 %v3028_v51 }
 0xd66   :  { %1919 = vmatpush1.bf16.msra.mxu1 %v3031_v8  ;;  %1974 = vmatprep.subr.bf16.mxu0 %v3034_v10 }
 0xd69   :  { %1975 = vmatpush1.bf16.msra.mxu0 %v3038_v13 }
 0xe0c   :  { %v1726_v0 = vpop.f32.mrf.mxu0 }
 0xe0e   :  { %v1728_v31 = vpop.f32.mrf.mxu0 }
 0xe10   :  { %v1730_v1 = vpop.f32.mrf.mxu0 }
 0xe12   :  { %v1731_v3 = vpop.f32.mrf.mxu0 }
 0xe19   :  { %v1782_v5 = vpop.f32.mrf.mxu1 }
 0xe1a   :  { %v1783_v6 = vadd.f32 %v1782_v5, %v1726_v0 }
 0xe1b   :  { %v1784_v33 = vpop.f32.mrf.mxu1 }
 0xe1c   :  { %v1789_v37 = vadd.f32 %v1783_v6, %v2775_v47  ;;  %v1840_v38 = vpop.f32.mrf.mxu0  ;;  %v1785_v51 = vadd.f32 %v1784_v33, %v1728_v31 }
 0xe1d   :  { %v1786_v19 = vpop.f32.mrf.mxu1  ;;  %v1849_v39 = vrot.slane %v1840_v38, 1  ;;  %v1851_v2 = vrot.slane %v1840_v38, 2 }
 0xe1e   :  { %2375 = vtanh.f32 %v1789_v37  ;;  %v1842_v35 = vpop.f32.mrf.mxu0  ;;  %v1790_v16 = vadd.f32 %v1785_v51, %v2779_v50 }
 0xe1f   :  { %v1857_v43 = vadd.f32 %v1849_v39, %v2666_v26  ;;  %v1859_v45 = vadd.f32 %v1851_v2, %v2670_v30  ;;  %v1787_v44 = vpop.f32.mrf.mxu1  ;;  %v1850_v48 = vrot.slane %v1842_v35, 1  ;;  %v1852_v32 = vrot.slane %v1842_v35, 2 }
 0xe20   :  { %v1844_v49 = vpop.f32.mrf.mxu0 }
 0xe21   :  { %2377 = vtanh.f32 %v1857_v43  ;;  %v1858_v8 = vadd.f32 %v1850_v48, %v2677_v40  ;;  %v1860_v10 = vadd.f32 %v1852_v32, %v2673_v34  ;;  %v1876_v40 = vrot.slane %v3115_v60, 7 }
 0xe22   :  { %2379 = vtanh.f32 %v1859_v45  ;;  %v1845_v13 = vpop.f32.mrf.mxu0 }
 0xe23   :  { %2381 = vtanh.f32 %v1858_v8 }
 0xe24   :  { %2383 = vtanh.f32 %v1860_v10 }
 0xe25   :  { %2385 = vtanh.f32 %v1790_v16 }
 0xe2b   :  { %v2376_v26 = vpop.eup %2375 }
 0xe2c   :  { %v1793_v56 = vmul.f32 0.5, %v2376_v26 }
 0xe2e   :  { %v2378_v54 = vpop.eup %2377  ;;  %v1794_v61 = vadd.f32 0.5, %v1793_v56  ;;  %v2251_v56 = vld [vmem:[%s3201_s7 + $0x18] sm:$0xff]  }
 0xe2f   :  { %v2380_v30 = vpop.eup %2379  ;;  %v1865_v55 = vmul.f32 0.5, %v2378_v54 }
 0xe30   :  { %v1866_v7 = vmul.f32 0.5, %v2380_v30  ;;  %v2382_v15 = vpop.eup %2381  ;;  %v1797_v60 = vmul.f32 %v1794_v61, %v3110_v58 }
 0xe31   :  { %v1867_v4 = vadd.f32 0.5, %v1865_v55  ;;  %v2384_v34 = vpop.eup %2383  ;;  %v1869_v41 = vmul.f32 0.5, %v2382_v15 }
 0xe32   :  { %v1868_v59 = vadd.f32 0.5, %v1866_v7  ;;  %v2386_v36 = vpop.eup %2385  ;;  %v1870_v24 = vmul.f32 0.5, %v2384_v34  ;;  %v2539_v7 = vmov 0.0  }
 0xe33   :  { %v1881_v11 = vmul.f32 %v2382_v15, %v1867_v4  ;;  %v1879_v63 = vmul.f32 %v1875_v57, %v1867_v4  ;;  %v1798_v21 = vmul.f32 %v2386_v36, %v1794_v61  ;;  %v1795_v28 = vmul.f32 0.5, %v2386_v36  ;;  %2186 = vmatprep.subr.bf16.mxu1 %v2539_v7  ;;  %v2254_v57 = vld [vmem:[%s3201_s7] sm:$0xff]  }
 0xe34   :  { %v1882_v52 = vmul.f32 %v2384_v34, %v1868_v59  ;;  %v1880_v42 = vmul.f32 %v1876_v40, %v1868_v59  ;;  %v1871_v29 = vadd.f32 0.5, %v1869_v41  ;;  %v1872_v22 = vadd.f32 0.5, %v1870_v24 }
 0xe35   :  { %1885 = vrot.lane.b32.xlu1 %v1881_v11, %s2538_s3  ;;  %v1796_v14 = vadd.f32 0.5, %v1795_v28 }
 0xe36   :  { %1887 = vrot.lane.b32.xlu0 %v1882_v52, %s2538_s3 }
 0xe39   :  { %1800 = vrot.lane.b32.xlu1 %v1798_v21, %s2538_s3 }
 0xea7   :  { %v1886_v53 = vpop.permute.xlu1 %1885 }
 0xea8   :  { %v1888_v46 = vpop.permute.xlu0 %1887  ;;  %v1891_v20 = vadd.f32 %v1886_v53, %v1879_v63 }
 0xea9   :  { %v1892_v27 = vadd.f32 %v1888_v46, %v1880_v42  ;;  %v2175_v42 = vld [vmem:[%s3202_s8] ss:$0 sm:$0xff] }
 0xeaa   :  { %2387 = vtanh.f32 %v1891_v20 }
 0xeab   :  { %2389 = vtanh.f32 %v1892_v27  ;;  %v1801_v25 = vpop.permute.xlu1 %1800 }
 0xeac   :  { %v3162_v18 = vadd.f32 %v1801_v25, %v1797_v60 }
 0xeae   :  { %2391 = vtanh.f32 %v3162_v18 }
 0xeb7   :  { %v2388_v23 = vpop.eup %2387 }
 0xeb8   :  { %v2390_v62 = vpop.eup %2389  ;;  %v1895_v9 = vmul.f32 %v2388_v23, %v1871_v29 }
 0xeb9   :  { %v1896_v12 = vmul.f32 %v2390_v62, %v1872_v22 }
 0xeba   :  { %v1945_v17 = vpack.c.bf16 %v1895_v9, %v1895_v9 }
 0xebb   :  { %v2392_v0 = vpop.eup %2391  ;;  %v1946_v31 = vpack.c.bf16 %v1896_v12, %v1896_v12 }
 0xebc   :  { %v1805_v58 = vmul.f32 %v2392_v0, %v1796_v14  ;;  %v1949_v1 = vunpack.c.l.b16 %v1945_v17 }
 0xebd   :  { %v1950_v3 = vunpack.c.l.b16 %v1946_v31 }
 0xebe   :  { %v1897_v5 = vpack.c.bf16 %v1805_v58, %v1805_v58  ;;  %v1951_v6 = vrot.slane %v1949_v1, 7 }
 0xebf   :  { %v1952_v33 = vrot.slane %v1950_v3, 6 }
 0xec0   :  { %1899 = vrot.lane.b32.xlu0 %v1897_v5, %s2538_s3 }
 0xec1   :  { %v1953_v37 = vsel %vm431_vm2, %v1952_v33, %v1951_v6 }
 0xec2   :  { %v1954_v38 = vpack.c.b16 %v1953_v37, %v1953_v37 }
 0xec4   :  { %1955 = vrot.lane.b32.xlu1 %v1954_v38, %s2538_s3 }
 0xf32   :  { %v1900_v19 = vpop.permute.xlu0 %1899 }
 0xf33   :  { %2173 = vmatmul.mubr.msk.bf16.vlgmr.msra.gmra.mxu1 %vm240_vm3, %v1900_v19 }
 0xf34   :  { %2194 = vmatprep.mubr.msk.bf16.mxu1 %vm2540_vm4, %v2539_v7  ;;  %2187 = vmatpush3.bf16.msra.mxu1 %v2251_v56 }
 0xf35   :  { %2188 = vmatprep.subr.bf16.mxu1 %v2539_v7 }
 0xf36   :  { %v1956_v39 = vpop.permute.xlu1 %1955 }
 0xf37   :  { %2174 = vmatmul.mubr.msk.bf16.vlgmr.msra.gmra.mxu0 %vm240_vm3, %v1956_v39 }
 0xff3   :  { %v1938_v2 = vpop.f32.mrf.mxu1 }
 0xff5   :  { %v1940_v35 = vpop.f32.mrf.mxu1 }
 0xff7   :  { %v1994_v43 = vpop.f32.mrf.mxu0  ;;  %v1942_v45 = vpop.f32.mrf.mxu1 }
 0xff8   :  { %v1995_v44 = vadd.f32 %v1994_v43, %v1938_v2 }
 0xff9   :  { %v1996_v48 = vpop.f32.mrf.mxu0  ;;  %v1943_v32 = vpop.f32.mrf.mxu1 }
 0xffa   :  { %v2001_v49 = vadd.f32 %v1995_v44, %v2775_v47  ;;  %v1997_v51 = vadd.f32 %v1996_v48, %v1940_v35  ;;  %v2252_v47 = vld [vmem:[%s3201_s7 + $0x10] sm:$0xff]  }
 0xffb   :  { %v1998_v8 = vpop.f32.mrf.mxu0  ;;  %2189 = vmatpush3.bf16.msra.mxu1 %v2252_v47 }
 0xffc   :  { %2393 = vtanh.f32 %v2001_v49  ;;  %v2002_v10 = vadd.f32 %v1997_v51, %v2779_v50  ;;  %v2253_v50 = vld [vmem:[%s3201_s7 + $0x8] sm:$0xff]   ;;  %2190 = vmatprep.subr.bf16.mxu1 %v2539_v7  ;;  %s2541_s7 = smov [#allocation10]  }
 0xffd   :  { %v1999_v13 = vpop.f32.mrf.mxu0  ;;  %s2112_s25 = sshll.u32 %s2541_s7, 4  ;;  %s2113_s25 = int_to_ptr.vmem [resolvable:$true] %s2112_s25 }
 0xffe   :  { %2395 = vtanh.f32 %v2002_v10  ;;  %s2503_s26 = scalar_lea.vmem %s2113_s25, 32  ;;  %p2508_p7 = scmp.lt.s32.totalorder %s2113_s25, %s2113_s25 }
 0xfff   :  { %2191 = vmatpush3.bf16.msra.mxu1 %v2253_v50  ;;  %p2504_p6 = scmp.ne.s32.totalorder %s2113_s25, %s2503_s26  ;;  %p2509_p8 = scmp.lt.s32.totalorder %s2503_s26, %s2503_s26 }
0x1000   :  { %2192 = vmatprep.subr.bf16.mxu1 %v2539_v7 }
0x1001   :  { %p2510_p9 = por %p2509_p8, %p2508_p7 }
0x1003   :  { %2193 = vmatpush3.bf16.msra.mxu1 %v2254_v57  ;;  %p2511_p10 = pnand %p2510_p9, %p2504_p6 }
0x1009   :  { %v2394_v16 = vpop.eup %2393 }
0x100a   :  { %v2005_v26 = vmul.f32 0.5, %v2394_v16 }
0x100b   :  { %v2396_v30 = vpop.eup %2395 }
0x100c   :  { %v2006_v54 = vadd.f32 0.5, %v2005_v26  ;;  %v2007_v59 = vmul.f32 0.5, %v2396_v30 }
0x100e   :  { %v2010_v55 = vmul.f32 %v2396_v30, %v2006_v54  ;;  %v2009_v4 = vmul.f32 %v2006_v54, %v3162_v18  ;;  %v2008_v34 = vadd.f32 0.5, %v2007_v59 }
0x1010   :  { %2012 = vrot.lane.b32.xlu0 %v2010_v55, %s2538_s3 }
0x1082   :  { %v2013_v15 = vpop.permute.xlu0 %2012 }
0x1083   :  { %v2015_v40 = vadd.f32 %v2013_v15, %v2009_v4 }
0x1085   :  { %2397 = vtanh.f32 %v2015_v40 }
0x1092   :  { %v2398_v11 = vpop.eup %2397 }
0x1093   :  { %v2017_v61 = vmul.f32 %v2398_v11, %v2008_v34 }
0x1095   :  { %v2018_v63 = vpack.c.bf16 %v2017_v61, %v2017_v61 }
0x1097   :  { %2035 = vrot.lane.b32.xlu1 %v2018_v63, %s2538_s3 }
0x1109   :  { %v2036_v52 = vpop.permute.xlu1 %2035 }
0x110a   :  { %2195 = vmatmul.mubr.msk.bf16.vlgmr.msra.gmra.mxu1 %vm240_vm3, %v2036_v52 }
0x11ca   :  { %v2098_v36 = vpop.f32.mrf.mxu1 }
0x11cb   :  { %v2099_v21 = vadd.f32 %v2175_v42, %v2098_v36 }
0x11cc   :  { %v2196_v53 = vpop.f32.mrf.mxu1 }
0x11cd   :  { %2105 = vst.msk [vmem:[#allocation10] sm:$0x3] %vm2104_vm5, %v2099_v21 }
0x11ce   :  { %v2101_v46 = vpop.f32.mrf.mxu1 }
0x11cf   :  { %2514 = shalt.err (!%p2511_p10)
}
0x11d0   :  { %2115 = dma.vmem_to_hbm [thread:$0]  %s2113_s25, 32, %s3203_s9, [#allocation4]   ;;  %v2197_v20 = vpop.f32.mrf.mxu1 }
0x11d1   :  { %2529 = dma.done.wait [#allocation4], 32  }
0x11d2   :  { %2530 = vsyncadd [#allocation4], 4294967264 }
0x11d3   :  { %2119 = vsyncpa [#allocation3], 1 }
0x11d4   :  { %2120 = vsyncpa [#allocation6], 1 }
0x11d5   :  { %2121 = vsyncpa [#allocation9], 1 }
0x11d6   :  { %2122 = vsyncpa [#allocation4], 1 }

</bundles_post_ra>
